<compile_context>
chip_gen: v5e
topology: v5e:2x2
jax: 0.10.0
libtpu: 0.0.40
codegen_flags: <defaults>
</compile_context>

<pallas_src>
import jax
import jax.numpy as jnp
from jax.experimental import pallas as pl
from jax.experimental.pallas import tpu as pltpu

EMB = 64          # emb_size
HID2 = 16         # w_ufi2 output size
BN_EPS = 1e-5


# ----------------------------------------------------------------------------
# Pallas kernel: the full (folded) MLP head of HeteInf.forward, per batch tile
# ----------------------------------------------------------------------------
def _heteinf_head_kernel(u_ref, f_ref, i_ref,
                         w1_ref, b1_ref,   # (3,E,E) bf16, (3,1,E) f32 : w_*1 (bn folded)
                         wm_ref, bm_ref,   # (3,E,E) bf16, (1,E)  f32 : w_*2@w_ufi1 (bn3 folded)
                         w2_ref, b2_ref,   # (E,16) bf16,  (1,16) f32 : w_ufi2 (bn4 folded)
                         w3_ref, b3_ref,   # (16,1) f32,   (1,1)  f32 : w_ufi3
                         out_ref):
    xs = (u_ref[...], f_ref[...], i_ref[...])   # user / influence / item tiles (TB, E) bf16

    # Sum of the three branch contributions accumulated into one f32 buffer
    # (x_u, x_f, x_i are never materialized: w_*2 @ w_ufi1 was folded on host).
    acc = None
    for k in range(3):
        # h_k = relu(bn(w_*1(x_k)))   (F.dropout is identity in eval mode)
        h = jnp.dot(xs[k], w1_ref[k], preferred_element_type=jnp.float32) + b1_ref[k]
        h = jnp.maximum(h, 0.0).astype(jnp.bfloat16)
        d = jnp.dot(h, wm_ref[k], preferred_element_type=jnp.float32)
        acc = d if acc is None else acc + d

    x = jnp.maximum(acc + bm_ref[...], 0.0)                       # relu(bn3(w_ufi1(cat)))
    x = jnp.dot(x.astype(jnp.bfloat16), w2_ref[...],
                preferred_element_type=jnp.float32) + b2_ref[...]
    x = jnp.maximum(x, 0.0)                                       # relu(bn4(w_ufi2(.)))

    logits = jnp.dot(x, w3_ref[...], preferred_element_type=jnp.float32) + b3_ref[...]
    out_ref[...] = jax.nn.sigmoid(logits)                         # (TB, 1)


def _resident_spec(arr):
    """Full-array BlockSpec with a constant index_map -> stays VMEM-resident."""
    zero = (0,) * arr.ndim
    return pl.BlockSpec(arr.shape, lambda g, _z=zero: _z)


def heteinf_head(u_embs, u_inf, i_embs, kparams, *, tb=128):
    """Batch-tiled Pallas launch of the HeteInf MLP head (eval mode).

    u_embs/u_inf/i_embs: [batch, EMB] float32; kparams: output of fold_params.
    tb: batch tile (multiple of 8; use 512-2048 for production batches,
        sized well inside v7x's 64 MiB VMEM even double-buffered).
    """
    B = u_embs.shape[0]
    nb = pl.cdiv(B, tb)
    Bp = nb * tb

    def prep(x):
        x = x.astype(jnp.bfloat16)          # halve HBM traffic (kernel is mem-bound)
        if Bp != B:
            x = jnp.pad(x, ((0, Bp - B), (0, 0)))
        return x

    u, f, i = prep(u_embs), prep(u_inf), prep(i_embs)
    worder = ("w1", "b1", "wm", "bm", "w2", "b2", "w3", "b3")
    weights = [kparams[k] for k in worder]

    tile = pl.BlockSpec((tb, EMB), lambda g: (g, 0))
    in_specs = [tile, tile, tile] + [_resident_spec(w) for w in weights]
    out_spec = pl.BlockSpec((tb, 1), lambda g: (g, 0))

    flops = 2 * Bp * (3 * EMB * EMB + 3 * EMB * EMB + EMB * HID2 + HID2)
    bytes_accessed = (3 * Bp * EMB * 2 + Bp * 4
                      + sum(int(w.size) * w.dtype.itemsize for w in weights))
    cost = pl.CostEstimate(flops=flops, transcendentals=Bp,
                           bytes_accessed=bytes_accessed)

    out = pl.pallas_call(
        _heteinf_head_kernel,
        out_shape=jax.ShapeDtypeStruct((Bp, 1), jnp.float32),
        grid=(nb,),
        in_specs=in_specs,
        out_specs=out_spec,
        compiler_params=pltpu.CompilerParams(
            dimension_semantics=("parallel",)),   # megacore on v7x
        cost_estimate=cost,
    )(u, f, i, *weights)
    return out[:B, 0]


# ----------------------------------------------------------------------------
# Host-side algebraic folds (pure linear algebra, no semantic change)
# ----------------------------------------------------------------------------
def fold_params(p):
    """Fold eval-mode BatchNorm into the adjacent Linears, collapse
    w_*2 @ w_ufi1 per branch, and cast large matrices to bf16."""
    s1, t1 = p["bn1_scale"], p["bn1_shift"]                    # (3,1,E)
    w1 = (p["w1"] * s1).astype(jnp.bfloat16)                   # (3,E,E)
    b1 = p["b1"] * s1 + t1                                     # (3,1,E) f32

    s3, t3 = p["bn3_scale"], p["bn3_shift"]                    # (1,E)
    wm = jnp.einsum("kio,kol->kil", p["w2"], p["wufi1"])       # (3,E,E)
    wm = (wm * s3[None]).astype(jnp.bfloat16)
    bm = jnp.einsum("kro,kol->rl", p["b2"], p["wufi1"]) + p["bufi1"]
    bm = bm * s3 + t3                                          # (1,E) f32

    s4, t4 = p["bn4_scale"], p["bn4_shift"]                    # (1,16)
    w2 = (p["wufi2"] * s4).astype(jnp.bfloat16)                # (E,16)
    b2 = p["bufi2"] * s4 + t4                                  # (1,16) f32

    return dict(w1=w1, b1=b1, wm=wm, bm=bm, w2=w2, b2=b2,
                w3=p["wufi3"], b3=p["bufi3"])                  # (16,1), (1,1) f32


# ----------------------------------------------------------------------------
# Deterministic parameter construction (mimics fresh PyTorch init shapes)
# ----------------------------------------------------------------------------
def _linear_init(key, fan_in, fan_out):
    kw, kb = jax.random.split(key)
    bound = 1.0 / jnp.sqrt(fan_in)
    w = jax.random.uniform(kw, (fan_in, fan_out), jnp.float32, -bound, bound)
    b = jax.random.uniform(kb, (fan_out,), jnp.float32, -bound, bound)
    return w, b


def _bn_fold(key, n):
    kg, kb, km, kv = jax.random.split(key, 4)
    gamma = 1.0 + 0.1 * jax.random.normal(kg, (n,), jnp.float32)
    beta = 0.1 * jax.random.normal(kb, (n,), jnp.float32)
    mean = 0.1 * jax.random.normal(km, (n,), jnp.float32)
    var = 1.0 + 0.1 * jax.random.uniform(kv, (n,), jnp.float32)
    scale = gamma / jnp.sqrt(var + BN_EPS)
    shift = beta - mean * scale
    return scale, shift


def init_params(key):
    keys = jax.random.split(key, 16)
    # branch 0: user (w_u1, w_u2, bn1) | 1: influence (w_f1, w_f2, bnf)
    # | 2: item (w_i1, w_i2, bn2)
    w1s, b1s, w2s, b2s, s1s, t1s = [], [], [], [], [], []
    for k in range(3):
        wa, ba = _linear_init(keys[k], EMB, EMB)
        wb, bb = _linear_init(keys[3 + k], EMB, EMB)
        sc, sh = _bn_fold(keys[6 + k], EMB)
        w1s.append(wa); b1s.append(ba[None, :])
        w2s.append(wb); b2s.append(bb[None, :])
        s1s.append(sc[None, :]); t1s.append(sh[None, :])

    wufi1, bufi1 = _linear_init(keys[9], 3 * EMB, EMB)   # (3E, E)
    wufi2, bufi2 = _linear_init(keys[10], EMB, HID2)
    wufi3, bufi3 = _linear_init(keys[11], HID2, 1)
    bn3_scale, bn3_shift = _bn_fold(keys[12], EMB)
    bn4_scale, bn4_shift = _bn_fold(keys[13], HID2)

    return {
        "w1": jnp.stack(w1s), "b1": jnp.stack(b1s),                 # (3,E,E), (3,1,E)
        "bn1_scale": jnp.stack(s1s), "bn1_shift": jnp.stack(t1s),   # (3,1,E)
        "w2": jnp.stack(w2s), "b2": jnp.stack(b2s),
        "wufi1": wufi1.reshape(3, EMB, EMB),                        # split by input chunk
        "bufi1": bufi1[None, :],
        "bn3_scale": bn3_scale[None, :], "bn3_shift": bn3_shift[None, :],
        "wufi2": wufi2, "bufi2": bufi2[None, :],
        "bn4_scale": bn4_scale[None, :], "bn4_shift": bn4_shift[None, :],
        "wufi3": wufi3, "bufi3": bufi3[None, :],
    }


# ----------------------------------------------------------------------------
# Pure-JAX f32 reference of the same head (unfolded, for correctness check)
# ----------------------------------------------------------------------------
def heteinf_head_ref(u, f, i, p):
    def branch(x, k):
        h = x @ p["w1"][k] + p["b1"][k]
        h = jnp.maximum(h * p["bn1_scale"][k] + p["bn1_shift"][k], 0.0)
        return h @ p["w2"][k] + p["b2"][k]
    x_u, x_f, x_i = branch(u, 0), branch(f, 1), branch(i, 2)
    x_ufi = jnp.concatenate([x_u, x_f, x_i], axis=1)
    x = x_ufi @ p["wufi1"].reshape(3 * EMB, EMB) + p["bufi1"]
    x = jnp.maximum(x * p["bn3_scale"] + p["bn3_shift"], 0.0)
    x = x @ p["wufi2"] + p["bufi2"]
    x = jnp.maximum(x * p["bn4_scale"] + p["bn4_shift"], 0.0)
    return jax.nn.sigmoid(x @ p["wufi3"] + p["bufi3"]).squeeze(-1)


if __name__ == "__main__":
    key = jax.random.PRNGKey(0)
    k_emb_u, k_emb_i, k_par, k_idx = jax.random.split(key, 4)

    B = 256                  # small batch of (user, item) pairs (2 grid steps at tb=128)
    USER_NUM, ITEM_NUM = 64, 64
    N_ACT = 5                # active neighbors per sample

    # Embedding tables (nn.Embedding(user_num/item_num, emb_size))
    user_table = jax.random.normal(k_emb_u, (USER_NUM, EMB), jnp.float32)
    item_table = jax.random.normal(k_emb_i, (ITEM_NUM, EMB), jnp.float32)

    ku, ki, ka = jax.random.split(k_idx, 3)
    users = jax.random.randint(ku, (B,), 0, USER_NUM)
    items = jax.random.randint(ki, (B,), 0, ITEM_NUM)
    act_users = jax.random.randint(ka, (B, N_ACT), 0, USER_NUM)

    # TODO(synk): FeatureAgg / InfluenceProp / Fusion / Attention source was not
    # provided with the module; their heterogeneous graph aggregation is
    # approximated here by embedding lookups + a neighbor mean (plain-JAX glue).
    u_embs = user_table[users]                              # ~ user_feat_social_agg(users)
    i_embs = item_table[items]                              # ~ item_feat_agg(items)
    u_inf = jnp.mean(user_table[act_users], axis=1)         # ~ social_inf_prop(...)

    params = init_params(k_par)
    kparams = fold_params(params)     # host-side BN / w2@wufi1 folds + bf16 cast

    scores = jax.block_until_ready(
        heteinf_head(u_embs, u_inf, i_embs, kparams, tb=128))
    ref = heteinf_head_ref(u_embs, u_inf, i_embs, params)

    assert scores.shape == (B,)
    err = float(jnp.max(jnp.abs(scores - ref)))
    assert err < 2e-2, err            # bf16 activations/weights vs f32 reference
    print("KERNEL_OK")
</pallas_src>

<mosaic_0001>
module attributes {stable_mosaic.version = 11 : i64} {
  func.func @_heteinf_head_kernel(%arg0: i32, %arg1: memref<128x64xbf16, #tpu.memory_space<vmem>>, %arg2: memref<128x64xbf16, #tpu.memory_space<vmem>>, %arg3: memref<128x64xbf16, #tpu.memory_space<vmem>>, %arg4: memref<3x64x64xbf16, #tpu.memory_space<vmem>>, %arg5: memref<3x1x64xf32, #tpu.memory_space<vmem>>, %arg6: memref<3x64x64xbf16, #tpu.memory_space<vmem>>, %arg7: memref<1x64xf32, #tpu.memory_space<vmem>>, %arg8: memref<64x16xbf16, #tpu.memory_space<vmem>>, %arg9: memref<1x16xf32, #tpu.memory_space<vmem>>, %arg10: memref<16x1xf32, #tpu.memory_space<vmem>>, %arg11: memref<1x1xf32, #tpu.memory_space<vmem>>, %arg12: memref<128x1xf32, #tpu.memory_space<vmem>>) attributes {dimension_semantics = [#tpu.dimension_semantics<parallel>], iteration_bounds = array<i64: 2>, scalar_prefetch = 0 : i64, scratch_operands = 0 : i64, tpu.core_type = #tpu.core_type<tc>, window_params = [{transform_indices = @transform_0, window_bounds = array<i64: 128, 64>}, {transform_indices = @transform_1, window_bounds = array<i64: 128, 64>}, {transform_indices = @transform_2, window_bounds = array<i64: 128, 64>}, {pipeline_mode = #tpu.pipeline_mode<synchronous>, transform_indices = @transform_3, window_bounds = array<i64: 3, 64, 64>}, {pipeline_mode = #tpu.pipeline_mode<synchronous>, transform_indices = @transform_4, window_bounds = array<i64: 3, 1, 64>}, {pipeline_mode = #tpu.pipeline_mode<synchronous>, transform_indices = @transform_5, window_bounds = array<i64: 3, 64, 64>}, {pipeline_mode = #tpu.pipeline_mode<synchronous>, transform_indices = @transform_6, window_bounds = array<i64: 1, 64>}, {pipeline_mode = #tpu.pipeline_mode<synchronous>, transform_indices = @transform_7, window_bounds = array<i64: 64, 16>}, {pipeline_mode = #tpu.pipeline_mode<synchronous>, transform_indices = @transform_8, window_bounds = array<i64: 1, 16>}, {pipeline_mode = #tpu.pipeline_mode<synchronous>, transform_indices = @transform_9, window_bounds = array<i64: 16, 1>}, {pipeline_mode = #tpu.pipeline_mode<synchronous>, transform_indices = @transform_10, window_bounds = array<i64: 1, 1>}, {transform_indices = @transform_11, window_bounds = array<i64: 128, 1>}]} {
    %c0 = arith.constant 0 : index
    %c0_0 = arith.constant 0 : index
    %0 = vector.load %arg1[%c0, %c0_0] : memref<128x64xbf16, #tpu.memory_space<vmem>>, vector<128x64xbf16>
    %c0_1 = arith.constant 0 : index
    %c0_2 = arith.constant 0 : index
    %1 = vector.load %arg2[%c0_1, %c0_2] : memref<128x64xbf16, #tpu.memory_space<vmem>>, vector<128x64xbf16>
    %c0_3 = arith.constant 0 : index
    %c0_4 = arith.constant 0 : index
    %2 = vector.load %arg3[%c0_3, %c0_4] : memref<128x64xbf16, #tpu.memory_space<vmem>>, vector<128x64xbf16>
    %c0_5 = arith.constant 0 : index
    %c0_6 = arith.constant 0 : index
    %c0_7 = arith.constant 0 : index
    %3 = vector.load %arg4[%c0_5, %c0_6, %c0_7] : memref<3x64x64xbf16, #tpu.memory_space<vmem>>, vector<1x64x64xbf16>
    %4 = vector.shape_cast %3 : vector<1x64x64xbf16> to vector<64x64xbf16>
    %cst = arith.constant dense<0.000000e+00> : vector<128x64xf32>
    %5 = tpu.matmul %0, %4, %cst {dimension_numbers = #tpu.dot_dimension_numbers<[1], [0], [0], [1], [0, 0, 1, 1], [], []>} : vector<128x64xbf16>, vector<64x64xbf16>, vector<128x64xf32> -> vector<128x64xf32>
    %c0_8 = arith.constant 0 : index
    %c0_9 = arith.constant 0 : index
    %c0_10 = arith.constant 0 : index
    %6 = vector.load %arg5[%c0_8, %c0_9, %c0_10] : memref<3x1x64xf32, #tpu.memory_space<vmem>>, vector<1x1x64xf32>
    %7 = vector.shape_cast %6 : vector<1x1x64xf32> to vector<1x64xf32>
    %8 = vector.broadcast %7 : vector<1x64xf32> to vector<128x64xf32>
    %9 = arith.addf %5, %8 : vector<128x64xf32>
    %cst_11 = arith.constant 0.000000e+00 : f32
    %10 = vector.broadcast %cst_11 : f32 to vector<128x64xf32>
    %11 = arith.maximumf %9, %10 : vector<128x64xf32>
    %12 = arith.truncf %11 : vector<128x64xf32> to vector<128x64xbf16>
    %c0_12 = arith.constant 0 : index
    %c0_13 = arith.constant 0 : index
    %c0_14 = arith.constant 0 : index
    %13 = vector.load %arg6[%c0_12, %c0_13, %c0_14] : memref<3x64x64xbf16, #tpu.memory_space<vmem>>, vector<1x64x64xbf16>
    %14 = vector.shape_cast %13 : vector<1x64x64xbf16> to vector<64x64xbf16>
    %cst_15 = arith.constant dense<0.000000e+00> : vector<128x64xf32>
    %15 = tpu.matmul %12, %14, %cst_15 {dimension_numbers = #tpu.dot_dimension_numbers<[1], [0], [0], [1], [0, 0, 1, 1], [], []>} : vector<128x64xbf16>, vector<64x64xbf16>, vector<128x64xf32> -> vector<128x64xf32>
    %c1 = arith.constant 1 : index
    %c0_16 = arith.constant 0 : index
    %c0_17 = arith.constant 0 : index
    %16 = vector.load %arg4[%c1, %c0_16, %c0_17] : memref<3x64x64xbf16, #tpu.memory_space<vmem>>, vector<1x64x64xbf16>
    %17 = vector.shape_cast %16 : vector<1x64x64xbf16> to vector<64x64xbf16>
    %cst_18 = arith.constant dense<0.000000e+00> : vector<128x64xf32>
    %18 = tpu.matmul %1, %17, %cst_18 {dimension_numbers = #tpu.dot_dimension_numbers<[1], [0], [0], [1], [0, 0, 1, 1], [], []>} : vector<128x64xbf16>, vector<64x64xbf16>, vector<128x64xf32> -> vector<128x64xf32>
    %c1_19 = arith.constant 1 : index
    %c0_20 = arith.constant 0 : index
    %c0_21 = arith.constant 0 : index
    %19 = vector.load %arg5[%c1_19, %c0_20, %c0_21] : memref<3x1x64xf32, #tpu.memory_space<vmem>>, vector<1x1x64xf32>
    %20 = vector.shape_cast %19 : vector<1x1x64xf32> to vector<1x64xf32>
    %21 = vector.broadcast %20 : vector<1x64xf32> to vector<128x64xf32>
    %22 = arith.addf %18, %21 : vector<128x64xf32>
    %cst_22 = arith.constant 0.000000e+00 : f32
    %23 = vector.broadcast %cst_22 : f32 to vector<128x64xf32>
    %24 = arith.maximumf %22, %23 : vector<128x64xf32>
    %25 = arith.truncf %24 : vector<128x64xf32> to vector<128x64xbf16>
    %c1_23 = arith.constant 1 : index
    %c0_24 = arith.constant 0 : index
    %c0_25 = arith.constant 0 : index
    %26 = vector.load %arg6[%c1_23, %c0_24, %c0_25] : memref<3x64x64xbf16, #tpu.memory_space<vmem>>, vector<1x64x64xbf16>
    %27 = vector.shape_cast %26 : vector<1x64x64xbf16> to vector<64x64xbf16>
    %cst_26 = arith.constant dense<0.000000e+00> : vector<128x64xf32>
    %28 = tpu.matmul %25, %27, %cst_26 {dimension_numbers = #tpu.dot_dimension_numbers<[1], [0], [0], [1], [0, 0, 1, 1], [], []>} : vector<128x64xbf16>, vector<64x64xbf16>, vector<128x64xf32> -> vector<128x64xf32>
    %29 = arith.addf %15, %28 : vector<128x64xf32>
    %c2 = arith.constant 2 : index
    %c0_27 = arith.constant 0 : index
    %c0_28 = arith.constant 0 : index
    %30 = vector.load %arg4[%c2, %c0_27, %c0_28] : memref<3x64x64xbf16, #tpu.memory_space<vmem>>, vector<1x64x64xbf16>
    %31 = vector.shape_cast %30 : vector<1x64x64xbf16> to vector<64x64xbf16>
    %cst_29 = arith.constant dense<0.000000e+00> : vector<128x64xf32>
    %32 = tpu.matmul %2, %31, %cst_29 {dimension_numbers = #tpu.dot_dimension_numbers<[1], [0], [0], [1], [0, 0, 1, 1], [], []>} : vector<128x64xbf16>, vector<64x64xbf16>, vector<128x64xf32> -> vector<128x64xf32>
    %c2_30 = arith.constant 2 : index
    %c0_31 = arith.constant 0 : index
    %c0_32 = arith.constant 0 : index
    %33 = vector.load %arg5[%c2_30, %c0_31, %c0_32] : memref<3x1x64xf32, #tpu.memory_space<vmem>>, vector<1x1x64xf32>
    %34 = vector.shape_cast %33 : vector<1x1x64xf32> to vector<1x64xf32>
    %35 = vector.broadcast %34 : vector<1x64xf32> to vector<128x64xf32>
    %36 = arith.addf %32, %35 : vector<128x64xf32>
    %cst_33 = arith.constant 0.000000e+00 : f32
    %37 = vector.broadcast %cst_33 : f32 to vector<128x64xf32>
    %38 = arith.maximumf %36, %37 : vector<128x64xf32>
    %39 = arith.truncf %38 : vector<128x64xf32> to vector<128x64xbf16>
    %c2_34 = arith.constant 2 : index
    %c0_35 = arith.constant 0 : index
    %c0_36 = arith.constant 0 : index
    %40 = vector.load %arg6[%c2_34, %c0_35, %c0_36] : memref<3x64x64xbf16, #tpu.memory_space<vmem>>, vector<1x64x64xbf16>
    %41 = vector.shape_cast %40 : vector<1x64x64xbf16> to vector<64x64xbf16>
    %cst_37 = arith.constant dense<0.000000e+00> : vector<128x64xf32>
    %42 = tpu.matmul %39, %41, %cst_37 {dimension_numbers = #tpu.dot_dimension_numbers<[1], [0], [0], [1], [0, 0, 1, 1], [], []>} : vector<128x64xbf16>, vector<64x64xbf16>, vector<128x64xf32> -> vector<128x64xf32>
    %43 = arith.addf %29, %42 : vector<128x64xf32>
    %c0_38 = arith.constant 0 : index
    %c0_39 = arith.constant 0 : index
    %44 = vector.load %arg7[%c0_38, %c0_39] : memref<1x64xf32, #tpu.memory_space<vmem>>, vector<1x64xf32>
    %45 = vector.broadcast %44 : vector<1x64xf32> to vector<128x64xf32>
    %46 = arith.addf %43, %45 : vector<128x64xf32>
    %cst_40 = arith.constant 0.000000e+00 : f32
    %47 = vector.broadcast %cst_40 : f32 to vector<128x64xf32>
    %48 = arith.maximumf %46, %47 : vector<128x64xf32>
    %49 = arith.truncf %48 : vector<128x64xf32> to vector<128x64xbf16>
    %c0_41 = arith.constant 0 : index
    %c0_42 = arith.constant 0 : index
    %50 = vector.load %arg8[%c0_41, %c0_42] : memref<64x16xbf16, #tpu.memory_space<vmem>>, vector<64x16xbf16>
    %cst_43 = arith.constant dense<0.000000e+00> : vector<128x16xf32>
    %51 = tpu.matmul %49, %50, %cst_43 {dimension_numbers = #tpu.dot_dimension_numbers<[1], [0], [0], [1], [0, 0, 1, 1], [], []>} : vector<128x64xbf16>, vector<64x16xbf16>, vector<128x16xf32> -> vector<128x16xf32>
    %c0_44 = arith.constant 0 : index
    %c0_45 = arith.constant 0 : index
    %52 = vector.load %arg9[%c0_44, %c0_45] : memref<1x16xf32, #tpu.memory_space<vmem>>, vector<1x16xf32>
    %53 = vector.broadcast %52 : vector<1x16xf32> to vector<128x16xf32>
    %54 = arith.addf %51, %53 : vector<128x16xf32>
    %cst_46 = arith.constant 0.000000e+00 : f32
    %55 = vector.broadcast %cst_46 : f32 to vector<128x16xf32>
    %56 = arith.maximumf %54, %55 : vector<128x16xf32>
    %c0_47 = arith.constant 0 : index
    %c0_48 = arith.constant 0 : index
    %57 = vector.load %arg10[%c0_47, %c0_48] : memref<16x1xf32, #tpu.memory_space<vmem>>, vector<16x1xf32>
    %cst_49 = arith.constant dense<0.000000e+00> : vector<128x1xf32>
    %58 = tpu.matmul %56, %57, %cst_49 {dimension_numbers = #tpu.dot_dimension_numbers<[1], [0], [0], [1], [0, 0, 1, 1], [], []>} : vector<128x16xf32>, vector<16x1xf32>, vector<128x1xf32> -> vector<128x1xf32>
    %c0_50 = arith.constant 0 : index
    %c0_51 = arith.constant 0 : index
    %59 = vector.load %arg11[%c0_50, %c0_51] : memref<1x1xf32, #tpu.memory_space<vmem>>, vector<1x1xf32>
    %60 = vector.broadcast %59 : vector<1x1xf32> to vector<128x1xf32>
    %61 = arith.addf %58, %60 : vector<128x1xf32>
    %62 = arith.negf %61 : vector<128x1xf32>
    %63 = math.exp %62 : vector<128x1xf32>
    %cst_52 = arith.constant 1.000000e+00 : f32
    %64 = vector.broadcast %cst_52 : f32 to vector<128x1xf32>
    %65 = arith.addf %64, %63 : vector<128x1xf32>
    %66 = arith.divf %64, %65 : vector<128x1xf32>
    %c0_53 = arith.constant 0 : index
    %c0_54 = arith.constant 0 : index
    %67 = vector.load %arg12[%c0_53, %c0_54] : memref<128x1xf32, #tpu.memory_space<vmem>>, vector<128x1xf32>
    tpu.vector_store %arg12[%c0_53, %c0_54], %66 {strides = array<i32>} : memref<128x1xf32, #tpu.memory_space<vmem>>, vector<128x1xf32>,
    return
  }
  func.func @transform_0(%arg0: i32) -> (i32, i32) {
    %c0_i32 = arith.constant 0 : i32
    %c0_i32_0 = arith.constant 0 : i32
    return %arg0, %c0_i32 : i32, i32
  }
  func.func @transform_1(%arg0: i32) -> (i32, i32) {
    %c0_i32 = arith.constant 0 : i32
    %c0_i32_0 = arith.constant 0 : i32
    return %arg0, %c0_i32 : i32, i32
  }
  func.func @transform_2(%arg0: i32) -> (i32, i32) {
    %c0_i32 = arith.constant 0 : i32
    %c0_i32_0 = arith.constant 0 : i32
    return %arg0, %c0_i32 : i32, i32
  }
  func.func @transform_3(%arg0: i32) -> (i32, i32, i32) {
    %c0_i32 = arith.constant 0 : i32
    %c0_i32_0 = arith.constant 0 : i32
    %c0_i32_1 = arith.constant 0 : i32
    %c0_i32_2 = arith.constant 0 : i32
    return %c0_i32, %c0_i32_0, %c0_i32_1 : i32, i32, i32
  }
  func.func @transform_4(%arg0: i32) -> (i32, i32, i32) {
    %c0_i32 = arith.constant 0 : i32
    %c0_i32_0 = arith.constant 0 : i32
    %c0_i32_1 = arith.constant 0 : i32
    %c0_i32_2 = arith.constant 0 : i32
    return %c0_i32, %c0_i32_0, %c0_i32_1 : i32, i32, i32
  }
  func.func @transform_5(%arg0: i32) -> (i32, i32, i32) {
    %c0_i32 = arith.constant 0 : i32
    %c0_i32_0 = arith.constant 0 : i32
    %c0_i32_1 = arith.constant 0 : i32
    %c0_i32_2 = arith.constant 0 : i32
    return %c0_i32, %c0_i32_0, %c0_i32_1 : i32, i32, i32
  }
  func.func @transform_6(%arg0: i32) -> (i32, i32) {
    %c0_i32 = arith.constant 0 : i32
    %c0_i32_0 = arith.constant 0 : i32
    %c0_i32_1 = arith.constant 0 : i32
    return %c0_i32, %c0_i32_0 : i32, i32
  }
  func.func @transform_7(%arg0: i32) -> (i32, i32) {
    %c0_i32 = arith.constant 0 : i32
    %c0_i32_0 = arith.constant 0 : i32
    %c0_i32_1 = arith.constant 0 : i32
    return %c0_i32, %c0_i32_0 : i32, i32
  }
  func.func @transform_8(%arg0: i32) -> (i32, i32) {
    %c0_i32 = arith.constant 0 : i32
    %c0_i32_0 = arith.constant 0 : i32
    %c0_i32_1 = arith.constant 0 : i32
    return %c0_i32, %c0_i32_0 : i32, i32
  }
  func.func @transform_9(%arg0: i32) -> (i32, i32) {
    %c0_i32 = arith.constant 0 : i32
    %c0_i32_0 = arith.constant 0 : i32
    %c0_i32_1 = arith.constant 0 : i32
    return %c0_i32, %c0_i32_0 : i32, i32
  }
  func.func @transform_10(%arg0: i32) -> (i32, i32) {
    %c0_i32 = arith.constant 0 : i32
    %c0_i32_0 = arith.constant 0 : i32
    %c0_i32_1 = arith.constant 0 : i32
    return %c0_i32, %c0_i32_0 : i32, i32
  }
  func.func @transform_11(%arg0: i32) -> (i32, i32) {
    %c0_i32 = arith.constant 0 : i32
    %c0_i32_0 = arith.constant 0 : i32
    return %arg0, %c0_i32 : i32, i32
  }
}

</mosaic_0001>

<bundles_post_ra>
// kernel: tpu_custom_call.1
= control target key start
LH: loop header
LB: loop body
LE: loop exit
PB: predicated region body
PF: predicated region fallthrough
CT: control target
= control target key end

     0   :  { %s2578_s19 = smov 0   ;;  %s2959_s0 = inlined_call_operand.vmem [shape: bf16[256,64], index: 0, kind: input, shape index: {}]   ;;  %s2960_s1 = inlined_call_operand.vmem [shape: bf16[256,64], index: 1, kind: input, shape index: {}]   ;;  %s2961_s2 = inlined_call_operand.vmem [shape: bf16[256,64], index: 2, kind: input, shape index: {}]   ;;  %s2962_s3 = inlined_call_operand.vmem [shape: bf16[3,64,64], index: 3, kind: input, shape index: {}]   ;;  %s2963_s4 = inlined_call_operand.vmem [shape: f32[3,1,64], index: 4, kind: input, shape index: {}]   ;;  %s2964_s5 = inlined_call_operand.vmem [shape: bf16[3,64,64], index: 5, kind: input, shape index: {}]   ;;  %s2965_s6 = inlined_call_operand.vmem [shape: f32[1,64], index: 6, kind: input, shape index: {}]   ;;  %s2966_s7 = inlined_call_operand.vmem [shape: bf16[64,16], index: 7, kind: input, shape index: {}]   ;;  %s2967_s8 = inlined_call_operand.vmem [shape: f32[1,16], index: 8, kind: input, shape index: {}]   ;;  %s2968_s9 = inlined_call_operand.vmem [shape: f32[16,1], index: 9, kind: input, shape index: {}]   ;;  %s2969_s10 = inlined_call_operand.<no memory space> [shape: f32[1,1], index: 10, kind: input, shape index: {}]   ;;  %s2970_s11 = inlined_call_operand.vmem [shape: f32[256,1], index: 11, kind: output, shape index: {}]  }
   0x1   :  { %v16_v0 = vstv %s2969_s10 }
   0x2   :  { %17 = vst [vmem:[#allocation2] sm:$0x1] %v16_v0 }
   0x3 LB: > { %s2032_s20 = sadd.s32 4294967295, %s2513_s19   ;;  %p2036_p0 = scmp.ge.s32.totalorder %s2513_s19, 1  ;;  %s2513_s19 = sphi %s2578_s19, %s23_s19  }
   0x4   : > { %p362_p1 = scmp.lt.s32.totalorder %s2513_s19, 3 }
   0x6   : > { %p363_p2 = pnand %p2036_p0, %p362_p1 }
   0x7   : > { %s2037_s24 = sshll.u32 (!%p363_p2), %s2032_s20, 4 }
   0x8   : > { %366 = sbr.rel (%p363_p2) target bundleno = 858 (0x35a), region = 64  ;;  %p413_p3 = scmp.lt.s32.totalorder (!%p363_p2), %s2037_s24, 31 }
   0xd   : > { %v2404_v1 = vld [vmem:[%s2962_s3 + $0x18] sm:$0xff]  ;;  %v2403_v3 = vld [vmem:[%s2962_s3 + $0x10] sm:$0xff]  ;;  %s2972_s24 = smov (!%p413_p3, %s2037_s24), 31  ;;  %v2402_v5 = vld [vmem:[%s2962_s3 + $0x8] sm:$0xff]  ;;  %vm561_vm0 = vcmask 523264   ;;  %vm1517_vm1 = vcmask 130048  }
   0xe   : > { %v2412_v2 = vld [vmem:[%s2962_s3 + $0x38] sm:$0xff]  ;;  %590 = vmatpush.bf16.msra.mxu0 %v2404_v1  ;;  %v2411_v4 = vld [vmem:[%s2962_s3 + $0x30] sm:$0xff]  ;;  %v2410_v6 = vld [vmem:[%s2962_s3 + $0x28] sm:$0xff]  ;;  %s2607_s14 = sshll.u32 %s2972_s24, 2  ;;  %s2044_s13 = sshll.u32 %s2972_s24, 3  ;;  %vm1935_vm5 = vcmask 7168  }
   0xf   : > { %773 = vmatpush.bf16.msra.mxu1 %v2412_v2  ;;  %v2401_v7 = vld [vmem:[%s2962_s3] sm:$0xff]  ;;  %s2619_s22 = scalar_lea.vmem %s2959_s0, %s2607_s14  ;;  %s2625_s25 = scalar_lea.vmem %s2960_s1, %s2607_s14  ;;  %v2420_v9 = vld [vmem:[%s2962_s3 + $0x58] sm:$0xff]  ;;  %v2419_v12 = vld [vmem:[%s2962_s3 + $0x50] sm:$0xff] }
  0x10   : > { %v2409_v8 = vld [vmem:[%s2962_s3 + $0x20] sm:$0xff]  ;;  %v2378_v13 = vld [vmem:[%s2619_s22 + $0x8] sm:$0xff]  ;;  %v2379_v15 = vld [vmem:[%s2619_s22 + $0x10] sm:$0xff]  ;;  %s2702_s10 = scalar_lea.vmem %s2961_s2, %s2607_s14  ;;  %s2910_s17 = scalar_lea.vmem %s2970_s11, %s2044_s13 }
  0x11   : > { %v2377_v10 = vld [vmem:[%s2619_s22] sm:$0xff]  ;;  %v2386_v14 = vld [vmem:[%s2625_s25 + $0x8] sm:$0xff]  ;;  %v2387_v16 = vld [vmem:[%s2625_s25 + $0x10] sm:$0xff] }
  0x12   : > { %591 = vmatpush.bf16.msra.mxu0 %v2403_v3  ;;  %v2385_v11 = vld [vmem:[%s2625_s25] sm:$0xff]  ;;  %v2418_v17 = vld [vmem:[%s2962_s3 + $0x48] sm:$0xff]  ;;  %v2380_v18 = vld [vmem:[%s2619_s22 + $0x18] sm:$0xff] }
  0x13   : > { %774 = vmatpush.bf16.msra.mxu1 %v2411_v4  ;;  %v2388_v19 = vld [vmem:[%s2625_s25 + $0x18] sm:$0xff]  ;;  %v2381_v20 = vld [vmem:[%s2619_s22 + $0x20] sm:$0xff]  ;;  %v2382_v23 = vld [vmem:[%s2619_s22 + $0x28] sm:$0xff] }
  0x14   : > { %v2389_v21 = vld [vmem:[%s2625_s25 + $0x20] sm:$0xff]  ;;  %v2390_v24 = vld [vmem:[%s2625_s25 + $0x28] sm:$0xff]  ;;  %v2416_v25 = vld [vmem:[%s2964_s5 + $0x38] sm:$0xff] }
  0x15   : > { %v2417_v22 = vld [vmem:[%s2962_s3 + $0x40] sm:$0xff]  ;;  %v2408_v26 = vld [vmem:[%s2964_s5 + $0x18] sm:$0xff]  ;;  %v2383_v27 = vld [vmem:[%s2619_s22 + $0x30] sm:$0xff]  ;;  %903 = vmatpush.bf16.msra.mxu2 %v2416_v25 }
  0x16   : > { %592 = vmatpush.bf16.msra.mxu0 %v2402_v5  ;;  %v2391_v28 = vld [vmem:[%s2625_s25 + $0x30] sm:$0xff]  ;;  %1000 = vmatpush.bf16.msra.mxu3 %v2408_v26  ;;  %v2414_v31 = vld [vmem:[%s2964_s5 + $0x28] sm:$0xff]  ;;  %v2413_v33 = vld [vmem:[%s2964_s5 + $0x20] sm:$0xff] }
  0x17   : > { %775 = vmatpush.bf16.msra.mxu1 %v2410_v6  ;;  %v2415_v29 = vld [vmem:[%s2964_s5 + $0x30] sm:$0xff]  ;;  %v2406_v32 = vld [vmem:[%s2964_s5 + $0x8] sm:$0xff]  ;;  %v2405_v34 = vld [vmem:[%s2964_s5] sm:$0xff] }
  0x18   : > { %v2407_v30 = vld [vmem:[%s2964_s5 + $0x10] sm:$0xff]  ;;  %v2384_v35 = vld [vmem:[%s2619_s22 + $0x38] sm:$0xff]  ;;  %v2393_v38 = vld [vmem:[%s2702_s10] sm:$0xff] }
  0x19   : > { %904 = vmatpush.bf16.msra.mxu2 %v2415_v29  ;;  %v2392_v36 = vld [vmem:[%s2625_s25 + $0x38] sm:$0xff]  ;;  %v2708_v41 = vld [vmem:[%s2963_s4 + $0x1] ss:$0 sm:$0xff]  ;;  %v2713_v42 = vld [vmem:[%s2963_s4] ss:$0 sm:$0xff] }
  0x1a   : > { %593 = vmatpush.bf16.msra.mxu0 %v2401_v7  ;;  %1001 = vmatpush.bf16.msra.mxu3 %v2407_v30  ;;  %v2424_v37 = vld [vmem:[%s2964_s5 + $0x58] sm:$0xff]  ;;  %v2394_v55 = vld [vmem:[%s2702_s10 + $0x8] sm:$0xff]  ;;  %v2423_v56 = vld [vmem:[%s2964_s5 + $0x50] sm:$0xff] }
  0x1b   : > { %776 = vmatpush.bf16.msra.mxu1 %v2409_v8  ;;  %v2395_v7 = vld [vmem:[%s2702_s10 + $0x10] sm:$0xff] }
  0x1d   : > { %2093 = vmatmul.msk.bf16.vlgmr.msra.gmra.mxu0 %vm561_vm0, %v2377_v10  ;;  %905 = vmatpush.bf16.msra.mxu2 %v2414_v31 }
  0x1e   : > { %1151 = vmatpush.bf16.msrb.mxu0 %v2420_v9  ;;  %2158 = vmatmul.msk.bf16.vlgmr.msra.gmra.mxu1 %vm561_vm0, %v2385_v11 }
  0x1f   : > { %1002 = vmatpush.bf16.msra.mxu3 %v2406_v32  ;;  %1281 = vmatpush.bf16.msrb.mxu1 %v2424_v37 }
  0x21   : > { %906 = vmatpush.bf16.msra.mxu2 %v2413_v33 }
  0x22   : > { %1152 = vmatpush.bf16.msrb.mxu0 %v2419_v12 }
  0x23   : > { %1003 = vmatpush.bf16.msra.mxu3 %v2405_v34  ;;  %1282 = vmatpush.bf16.msrb.mxu1 %v2423_v56  ;;  %v2421_v56 = vld [vmem:[%s2964_s5 + $0x40] sm:$0xff] }
  0x26   : > { %1153 = vmatpush.bf16.msrb.mxu0 %v2418_v17 }
  0x2a   : > { %1154 = vmatpush.bf16.msrb.mxu0 %v2417_v22  ;;  %v2396_v22 = vld [vmem:[%s2702_s10 + $0x18] sm:$0xff] }
  0x2d   : > { %2094 = vmatmul.msk.bf16.gmra.mxu0 %vm561_vm0, %v2378_v13 }
  0x2e   : > { %2159 = vmatmul.msk.bf16.gmra.mxu1 %vm561_vm0, %v2386_v14 }
  0x3d   : > { %2095 = vmatmul.msk.bf16.gmra.mxu0 %vm561_vm0, %v2379_v15 }
  0x3e   : > { %2160 = vmatmul.msk.bf16.gmra.mxu1 %vm561_vm0, %v2387_v16 }
  0x4d   : > { %2096 = vmatmul.msk.bf16.gmra.mxu0 %vm561_vm0, %v2380_v18 }
  0x4e   : > { %2161 = vmatmul.msk.bf16.gmra.mxu1 %vm561_vm0, %v2388_v19 }
  0x5d   : > { %2097 = vmatmul.msk.bf16.gmra.mxu0 %vm561_vm0, %v2381_v20 }
  0x5e   : > { %2162 = vmatmul.msk.bf16.gmra.mxu1 %vm561_vm0, %v2389_v21 }
  0x6d   : > { %2098 = vmatmul.msk.bf16.gmra.mxu0 %vm561_vm0, %v2382_v23  ;;  %v2422_v23 = vld [vmem:[%s2964_s5 + $0x48] sm:$0xff] }
  0x6e   : > { %2163 = vmatmul.msk.bf16.gmra.mxu1 %vm561_vm0, %v2390_v24 }
  0x6f   : > { %1283 = vmatpush.bf16.msrb.mxu1 %v2422_v23 }
  0x73   : > { %1284 = vmatpush.bf16.msrb.mxu1 %v2421_v56 }
  0x7d   : > { %2099 = vmatmul.msk.bf16.gmra.mxu0 %vm561_vm0, %v2383_v27 }
  0x7e   : > { %2164 = vmatmul.msk.bf16.gmra.mxu1 %vm561_vm0, %v2391_v28 }
  0x8d   : > { %2100 = vmatmul.msk.bf16.gmra.mxu0 %vm561_vm0, %v2384_v35 }
  0x8e   : > { %2165 = vmatmul.msk.bf16.gmra.mxu1 %vm561_vm0, %v2392_v36 }
  0x9a   : > { %v595_v39 = vpop.f32.mrf.mxu0 }
  0x9b   : > { %v778_v40 = vpop.f32.mrf.mxu1  ;;  %v596_v44 = vadd.f32 %v2713_v42, %v595_v39 }
  0x9c   : > { %v779_v43 = vadd.f32 %v2708_v41, %v778_v40 }
  0x9d   : > { %2279 = vmatmul.msk.bf16.vlgmr.msrb.gmra.mxu0 %vm561_vm0, %v2393_v38  ;;  %v635_v50 = vmax.f32 %v596_v44, 0.0  ;;  %v2397_v38 = vld [vmem:[%s2702_s10 + $0x20] sm:$0xff] }
  0x9e   : > { %v818_v47 = vmax.f32 %v779_v43, 0.0 }
  0xa2   : > { %v597_v45 = vpop.f32.mrf.mxu0 }
  0xa3   : > { %v780_v46 = vpop.f32.mrf.mxu1  ;;  %v598_v48 = vadd.f32 %v2713_v42, %v597_v45 }
  0xa4   : > { %v781_v49 = vadd.f32 %v2708_v41, %v780_v46 }
  0xa5   : > { %v636_v51 = vmax.f32 %v598_v48, 0.0 }
  0xa6   : > { %v819_v52 = vmax.f32 %v781_v49, 0.0 }
  0xa7   : > { %v651_v54 = vpack.c.bf16 %v636_v51, %v635_v50 }
  0xa8   : > { %v834_v53 = vpack.c.bf16 %v819_v52, %v818_v47 }
  0xa9   : > { %2214 = vmatmul.msk.bf16.vlgmr.msra.gmra.mxu3 %vm561_vm0, %v651_v54 }
  0xaa   : > { %2190 = vmatmul.msk.bf16.vlgmr.msra.gmra.mxu2 %vm561_vm0, %v834_v53  ;;  %v600_v57 = vpop.f32.mrf.mxu0 }
  0xab   : > { %v783_v58 = vpop.f32.mrf.mxu1  ;;  %v601_v60 = vadd.f32 %v2713_v42, %v600_v57 }
  0xac   : > { %v784_v59 = vadd.f32 %v2708_v41, %v783_v58 }
  0xad   : > { %2280 = vmatmul.msk.bf16.gmra.mxu0 %vm561_vm0, %v2394_v55  ;;  %v637_v2 = vmax.f32 %v601_v60, 0.0  ;;  %v2398_v55 = vld [vmem:[%s2702_s10 + $0x28] sm:$0xff] }
  0xae   : > { %v820_v63 = vmax.f32 %v784_v59, 0.0 }
  0xb2   : > { %v602_v61 = vpop.f32.mrf.mxu0 }
  0xb3   : > { %v785_v62 = vpop.f32.mrf.mxu1  ;;  %v603_v0 = vadd.f32 %v2713_v42, %v602_v61 }
  0xb4   : > { %v786_v1 = vadd.f32 %v2708_v41, %v785_v62 }
  0xb5   : > { %v638_v3 = vmax.f32 %v603_v0, 0.0 }
  0xb6   : > { %v821_v4 = vmax.f32 %v786_v1, 0.0 }
  0xb7   : > { %v652_v6 = vpack.c.bf16 %v638_v3, %v637_v2 }
  0xb8   : > { %v835_v5 = vpack.c.bf16 %v821_v4, %v820_v63 }
  0xb9   : > { %2215 = vmatmul.msk.bf16.gmra.mxu3 %vm561_vm0, %v652_v6 }
  0xba   : > { %2191 = vmatmul.msk.bf16.gmra.mxu2 %vm561_vm0, %v835_v5  ;;  %v605_v8 = vpop.f32.mrf.mxu0 }
  0xbb   : > { %v788_v9 = vpop.f32.mrf.mxu1  ;;  %v606_v11 = vadd.f32 %v2713_v42, %v605_v8 }
  0xbc   : > { %v789_v10 = vadd.f32 %v2708_v41, %v788_v9 }
  0xbd   : > { %2281 = vmatmul.msk.bf16.gmra.mxu0 %vm561_vm0, %v2395_v7  ;;  %v639_v17 = vmax.f32 %v606_v11, 0.0  ;;  %v2399_v7 = vld [vmem:[%s2702_s10 + $0x30] sm:$0xff] }
  0xbe   : > { %v822_v14 = vmax.f32 %v789_v10, 0.0 }
  0xc2   : > { %v607_v12 = vpop.f32.mrf.mxu0 }
  0xc3   : > { %v790_v13 = vpop.f32.mrf.mxu1  ;;  %v608_v15 = vadd.f32 %v2713_v42, %v607_v12 }
  0xc4   : > { %v791_v16 = vadd.f32 %v2708_v41, %v790_v13 }
  0xc5   : > { %v640_v18 = vmax.f32 %v608_v15, 0.0 }
  0xc6   : > { %v823_v19 = vmax.f32 %v791_v16, 0.0 }
  0xc7   : > { %v653_v21 = vpack.c.bf16 %v640_v18, %v639_v17 }
  0xc8   : > { %v836_v20 = vpack.c.bf16 %v823_v19, %v822_v14 }
  0xc9   : > { %2216 = vmatmul.msk.bf16.gmra.mxu3 %vm561_vm0, %v653_v21 }
  0xca   : > { %2192 = vmatmul.msk.bf16.gmra.mxu2 %vm561_vm0, %v836_v20  ;;  %v610_v24 = vpop.f32.mrf.mxu0 }
  0xcb   : > { %v793_v25 = vpop.f32.mrf.mxu1  ;;  %v611_v27 = vadd.f32 %v2713_v42, %v610_v24 }
  0xcc   : > { %v794_v26 = vadd.f32 %v2708_v41, %v793_v25 }
  0xcd   : > { %2282 = vmatmul.msk.bf16.gmra.mxu0 %vm561_vm0, %v2396_v22  ;;  %v641_v33 = vmax.f32 %v611_v27, 0.0  ;;  %v2400_v22 = vld [vmem:[%s2702_s10 + $0x38] sm:$0xff] }
  0xce   : > { %v824_v30 = vmax.f32 %v794_v26, 0.0 }
  0xd2   : > { %v612_v28 = vpop.f32.mrf.mxu0 }
  0xd3   : > { %v795_v29 = vpop.f32.mrf.mxu1  ;;  %v613_v31 = vadd.f32 %v2713_v42, %v612_v28 }
  0xd4   : > { %v796_v32 = vadd.f32 %v2708_v41, %v795_v29 }
  0xd5   : > { %v642_v34 = vmax.f32 %v613_v31, 0.0 }
  0xd6   : > { %v825_v35 = vmax.f32 %v796_v32, 0.0 }
  0xd7   : > { %v654_v37 = vpack.c.bf16 %v642_v34, %v641_v33 }
  0xd8   : > { %v837_v36 = vpack.c.bf16 %v825_v35, %v824_v30 }
  0xd9   : > { %2217 = vmatmul.msk.bf16.gmra.mxu3 %vm561_vm0, %v654_v37  ;;  %v2428_v37 = vld [vmem:[%s2966_s7 + $0x18] sm:$0xff] }
  0xda   : > { %2193 = vmatmul.msk.bf16.gmra.mxu2 %vm561_vm0, %v837_v36  ;;  %v615_v39 = vpop.f32.mrf.mxu0 }
  0xdb   : > { %v798_v40 = vpop.f32.mrf.mxu1  ;;  %v616_v44 = vadd.f32 %v2713_v42, %v615_v39  ;;  %1450 = vmatpush.bf16.msrb.mxu2 %v2428_v37 }
  0xdc   : > { %v799_v43 = vadd.f32 %v2708_v41, %v798_v40 }
  0xdd   : > { %2283 = vmatmul.msk.bf16.gmra.mxu0 %vm561_vm0, %v2397_v38  ;;  %v643_v50 = vmax.f32 %v616_v44, 0.0 }
  0xde   : > { %v826_v47 = vmax.f32 %v799_v43, 0.0 }
  0xe2   : > { %v617_v45 = vpop.f32.mrf.mxu0 }
  0xe3   : > { %v800_v46 = vpop.f32.mrf.mxu1  ;;  %v618_v48 = vadd.f32 %v2713_v42, %v617_v45 }
  0xe4   : > { %v801_v49 = vadd.f32 %v2708_v41, %v800_v46 }
  0xe5   : > { %v644_v51 = vmax.f32 %v618_v48, 0.0 }
  0xe6   : > { %v827_v52 = vmax.f32 %v801_v49, 0.0 }
  0xe7   : > { %v655_v53 = vpack.c.bf16 %v644_v51, %v643_v50 }
  0xe8   : > { %v838_v54 = vpack.c.bf16 %v827_v52, %v826_v47 }
  0xe9   : > { %2218 = vmatmul.msk.bf16.gmra.mxu3 %vm561_vm0, %v655_v53  ;;  %v2427_v53 = vld [vmem:[%s2966_s7 + $0x10] sm:$0xff] }
  0xea   : > { %2194 = vmatmul.msk.bf16.gmra.mxu2 %vm561_vm0, %v838_v54  ;;  %v620_v57 = vpop.f32.mrf.mxu0 }
  0xeb   : > { %v803_v58 = vpop.f32.mrf.mxu1  ;;  %v621_v60 = vadd.f32 %v2713_v42, %v620_v57  ;;  %1451 = vmatpush.bf16.msrb.mxu2 %v2427_v53 }
  0xec   : > { %v804_v59 = vadd.f32 %v2708_v41, %v803_v58 }
  0xed   : > { %2284 = vmatmul.msk.bf16.gmra.mxu0 %vm561_vm0, %v2398_v55  ;;  %v645_v2 = vmax.f32 %v621_v60, 0.0 }
  0xee   : > { %v828_v63 = vmax.f32 %v804_v59, 0.0 }
  0xf2   : > { %v622_v61 = vpop.f32.mrf.mxu0 }
  0xf3   : > { %v805_v62 = vpop.f32.mrf.mxu1  ;;  %v623_v0 = vadd.f32 %v2713_v42, %v622_v61 }
  0xf4   : > { %v806_v1 = vadd.f32 %v2708_v41, %v805_v62 }
  0xf5   : > { %v646_v3 = vmax.f32 %v623_v0, 0.0 }
  0xf6   : > { %v829_v4 = vmax.f32 %v806_v1, 0.0 }
  0xf7   : > { %v656_v5 = vpack.c.bf16 %v646_v3, %v645_v2 }
  0xf8   : > { %v839_v6 = vpack.c.bf16 %v829_v4, %v828_v63  ;;  %v2426_v4 = vld [vmem:[%s2966_s7 + $0x8] sm:$0xff] }
  0xf9   : > { %2219 = vmatmul.msk.bf16.gmra.mxu3 %vm561_vm0, %v656_v5  ;;  %1452 = vmatpush.bf16.msrb.mxu2 %v2426_v4 }
  0xfa   : > { %2195 = vmatmul.msk.bf16.gmra.mxu2 %vm561_vm0, %v839_v6  ;;  %v625_v8 = vpop.f32.mrf.mxu0 }
  0xfb   : > { %v808_v9 = vpop.f32.mrf.mxu1  ;;  %v626_v11 = vadd.f32 %v2713_v42, %v625_v8 }
  0xfc   : > { %v809_v10 = vadd.f32 %v2708_v41, %v808_v9 }
  0xfd   : > { %2285 = vmatmul.msk.bf16.gmra.mxu0 %vm561_vm0, %v2399_v7  ;;  %v647_v17 = vmax.f32 %v626_v11, 0.0 }
  0xfe   : > { %v830_v14 = vmax.f32 %v809_v10, 0.0 }
 0x102   : > { %v627_v12 = vpop.f32.mrf.mxu0 }
 0x103   : > { %v810_v13 = vpop.f32.mrf.mxu1  ;;  %v628_v15 = vadd.f32 %v2713_v42, %v627_v12 }
 0x104   : > { %v811_v16 = vadd.f32 %v2708_v41, %v810_v13 }
 0x105   : > { %v648_v18 = vmax.f32 %v628_v15, 0.0 }
 0x106   : > { %v831_v19 = vmax.f32 %v811_v16, 0.0 }
 0x107   : > { %v657_v20 = vpack.c.bf16 %v648_v18, %v647_v17 }
 0x108   : > { %v840_v21 = vpack.c.bf16 %v831_v19, %v830_v14  ;;  %v2425_v19 = vld [vmem:[%s2966_s7] sm:$0xff] }
 0x109   : > { %2220 = vmatmul.msk.bf16.gmra.mxu3 %vm561_vm0, %v657_v20  ;;  %1453 = vmatpush.bf16.msrb.mxu2 %v2425_v19 }
 0x10a   : > { %2196 = vmatmul.msk.bf16.gmra.mxu2 %vm561_vm0, %v840_v21  ;;  %v630_v23 = vpop.f32.mrf.mxu0 }
 0x10b   : > { %v813_v24 = vpop.f32.mrf.mxu1  ;;  %v631_v26 = vadd.f32 %v2713_v42, %v630_v23 }
 0x10c   : > { %v814_v25 = vadd.f32 %v2708_v41, %v813_v24 }
 0x10d   : > { %2286 = vmatmul.msk.bf16.gmra.mxu0 %vm561_vm0, %v2400_v22  ;;  %v649_v32 = vmax.f32 %v631_v26, 0.0 }
 0x10e   : > { %v832_v29 = vmax.f32 %v814_v25, 0.0 }
 0x112   : > { %v632_v27 = vpop.f32.mrf.mxu0 }
 0x113   : > { %v815_v28 = vpop.f32.mrf.mxu1  ;;  %v633_v30 = vadd.f32 %v2713_v42, %v632_v27  ;;  %v2793_v42 = vld [vmem:[%s2963_s4 + $0x2] ss:$0 sm:$0xff] }
 0x114   : > { %v816_v31 = vadd.f32 %v2708_v41, %v815_v28 }
 0x115   : > { %v650_v33 = vmax.f32 %v633_v30, 0.0 }
 0x116   : > { %v833_v34 = vmax.f32 %v816_v31, 0.0 }
 0x117   : > { %v658_v35 = vpack.c.bf16 %v650_v33, %v649_v32 }
 0x118   : > { %v841_v36 = vpack.c.bf16 %v833_v34, %v832_v29 }
 0x119   : > { %2221 = vmatmul.msk.bf16.gmra.mxu3 %vm561_vm0, %v658_v35 }
 0x11a   : > { %2197 = vmatmul.msk.bf16.gmra.mxu2 %vm561_vm0, %v841_v36  ;;  %v1156_v38 = vpop.f32.mrf.mxu0 }
 0x11b   : > { %v1157_v41 = vadd.f32 %v2793_v42, %v1156_v38 }
 0x11d   : > { %v1196_v43 = vmax.f32 %v1157_v41, 0.0 }
 0x122   : > { %v1158_v39 = vpop.f32.mrf.mxu0 }
 0x123   : > { %v1159_v40 = vadd.f32 %v2793_v42, %v1158_v39 }
 0x125   : > { %v1197_v44 = vmax.f32 %v1159_v40, 0.0 }
 0x127   : > { %v1212_v45 = vpack.c.bf16 %v1197_v44, %v1196_v43  ;;  %v1512_v43 = vld [vmem:[%s2968_s9 + $0x8] sm:$0xff] }
 0x128   : > { %1580 = vmatpush.msrb.mxu3 %v1512_v43 }
 0x129   : > { %2311 = vmatmul.msk.bf16.vlgmr.msrb.gmra.mxu1 %vm561_vm0, %v1212_v45 }
 0x12a   : > { %v1161_v46 = vpop.f32.mrf.mxu0 }
 0x12b   : > { %v1162_v47 = vadd.f32 %v2793_v42, %v1161_v46 }
 0x12c   : > { %v1005_v25 = vpop.f32.mrf.mxu3 }
 0x12d   : > { %v1198_v50 = vmax.f32 %v1162_v47, 0.0  ;;  %v908_v23 = vpop.f32.mrf.mxu2 }
 0x12e   : > { %v1006_v45 = vadd.f32 %v1005_v25, %v908_v23 }
 0x132   : > { %v1163_v48 = vpop.f32.mrf.mxu0 }
 0x133   : > { %v1164_v49 = vadd.f32 %v2793_v42, %v1163_v48 }
 0x134   : > { %v1007_v31 = vpop.f32.mrf.mxu3 }
 0x135   : > { %v1199_v51 = vmax.f32 %v1164_v49, 0.0  ;;  %v910_v30 = vpop.f32.mrf.mxu2 }
 0x136   : > { %v1008_v49 = vadd.f32 %v1007_v31, %v910_v30 }
 0x137   : > { %v1213_v52 = vpack.c.bf16 %v1199_v51, %v1198_v50 }
 0x139   : > { %2312 = vmatmul.msk.bf16.gmra.mxu1 %vm561_vm0, %v1213_v52 }
 0x13a   : > { %v1166_v54 = vpop.f32.mrf.mxu0 }
 0x13b   : > { %v1167_v55 = vadd.f32 %v2793_v42, %v1166_v54 }
 0x13c   : > { %v1010_v41 = vpop.f32.mrf.mxu3 }
 0x13d   : > { %v1200_v58 = vmax.f32 %v1167_v55, 0.0  ;;  %v913_v37 = vpop.f32.mrf.mxu2 }
 0x142   : > { %v1168_v56 = vpop.f32.mrf.mxu0 }
 0x143   : > { %v1169_v57 = vadd.f32 %v2793_v42, %v1168_v56 }
 0x144   : > { %v1012_v40 = vpop.f32.mrf.mxu3 }
 0x145   : > { %v1201_v59 = vmax.f32 %v1169_v57, 0.0  ;;  %v915_v39 = vpop.f32.mrf.mxu2 }
 0x147   : > { %v1214_v60 = vpack.c.bf16 %v1201_v59, %v1200_v58 }
 0x149   : > { %2313 = vmatmul.msk.bf16.gmra.mxu1 %vm561_vm0, %v1214_v60  ;;  %v1011_v60 = vadd.f32 %v1010_v41, %v913_v37 }
 0x14a   : > { %v1171_v61 = vpop.f32.mrf.mxu0 }
 0x14b   : > { %v1172_v62 = vadd.f32 %v2793_v42, %v1171_v61 }
 0x14c   : > { %v1015_v48 = vpop.f32.mrf.mxu3 }
 0x14d   : > { %v1202_v1 = vmax.f32 %v1172_v62, 0.0  ;;  %v918_v46 = vpop.f32.mrf.mxu2  ;;  %v1013_v62 = vadd.f32 %v1012_v40, %v915_v39 }
 0x152   : > { %v1173_v63 = vpop.f32.mrf.mxu0 }
 0x153   : > { %v1174_v0 = vadd.f32 %v2793_v42, %v1173_v63 }
 0x154   : > { %v1017_v58 = vpop.f32.mrf.mxu3 }
 0x155   : > { %v1203_v2 = vmax.f32 %v1174_v0, 0.0  ;;  %v920_v56 = vpop.f32.mrf.mxu2 }
 0x157   : > { %v1215_v3 = vpack.c.bf16 %v1203_v2, %v1202_v1 }
 0x159   : > { %2314 = vmatmul.msk.bf16.gmra.mxu1 %vm561_vm0, %v1215_v3 }
 0x15a   : > { %v1176_v5 = vpop.f32.mrf.mxu0 }
 0x15b   : > { %v1177_v6 = vadd.f32 %v2793_v42, %v1176_v5 }
 0x15c   : > { %v1020_v3 = vpop.f32.mrf.mxu3 }
 0x15d   : > { %v1204_v9 = vmax.f32 %v1177_v6, 0.0  ;;  %v923_v0 = vpop.f32.mrf.mxu2 }
 0x162   : > { %v1178_v7 = vpop.f32.mrf.mxu0 }
 0x163   : > { %v1179_v8 = vadd.f32 %v2793_v42, %v1178_v7 }
 0x165   : > { %v1205_v10 = vmax.f32 %v1179_v8, 0.0 }
 0x167   : > { %v1216_v11 = vpack.c.bf16 %v1205_v10, %v1204_v9  ;;  %v1016_v9 = vadd.f32 %v1015_v48, %v918_v46  ;;  %v925_v10 = vpop.f32.mrf.mxu2 }
 0x169   : > { %2315 = vmatmul.msk.bf16.gmra.mxu1 %vm561_vm0, %v1216_v11  ;;  %v1022_v11 = vpop.f32.mrf.mxu3 }
 0x16a   : > { %v1181_v12 = vpop.f32.mrf.mxu0 }
 0x16b   : > { %v1182_v13 = vadd.f32 %v2793_v42, %v1181_v12 }
 0x16d   : > { %v1206_v16 = vmax.f32 %v1182_v13, 0.0  ;;  %v1018_v13 = vadd.f32 %v1017_v58, %v920_v56 }
 0x172   : > { %v1183_v14 = vpop.f32.mrf.mxu0 }
 0x173   : > { %v1184_v15 = vadd.f32 %v2793_v42, %v1183_v14 }
 0x175   : > { %v1207_v17 = vmax.f32 %v1184_v15, 0.0 }
 0x177   : > { %v1217_v18 = vpack.c.bf16 %v1207_v17, %v1206_v16 }
 0x179   : > { %2316 = vmatmul.msk.bf16.gmra.mxu1 %vm561_vm0, %v1217_v18  ;;  %v928_v18 = vpop.f32.mrf.mxu2 }
 0x17a   : > { %v1186_v20 = vpop.f32.mrf.mxu0 }
 0x17b   : > { %v1187_v21 = vadd.f32 %v2793_v42, %v1186_v20 }
 0x17d   : > { %v1208_v26 = vmax.f32 %v1187_v21, 0.0  ;;  %v1025_v21 = vpop.f32.mrf.mxu3 }
 0x17e   : > { %v1026_v39 = vadd.f32 %v1025_v21, %v928_v18 }
 0x182   : > { %v1188_v22 = vpop.f32.mrf.mxu0 }
 0x183   : > { %v1189_v24 = vadd.f32 %v2793_v42, %v1188_v22 }
 0x185   : > { %v1209_v27 = vmax.f32 %v1189_v24, 0.0  ;;  %v1021_v24 = vadd.f32 %v1020_v3, %v923_v0 }
 0x187   : > { %v1218_v28 = vpack.c.bf16 %v1209_v27, %v1208_v26  ;;  %v1023_v26 = vadd.f32 %v1022_v11, %v925_v10  ;;  %v930_v27 = vpop.f32.mrf.mxu2 }
 0x189   : > { %2317 = vmatmul.msk.bf16.gmra.mxu1 %vm561_vm0, %v1218_v28  ;;  %v1027_v28 = vpop.f32.mrf.mxu3 }
 0x18a   : > { %v1191_v29 = vpop.f32.mrf.mxu0  ;;  %v1028_v43 = vadd.f32 %v1027_v28, %v930_v27 }
 0x18b   : > { %v1192_v32 = vadd.f32 %v2793_v42, %v1191_v29 }
 0x18d   : > { %v1210_v35 = vmax.f32 %v1192_v32, 0.0 }
 0x191   : > { %v1030_v41 = vpop.f32.mrf.mxu3 }
 0x192   : > { %v1193_v33 = vpop.f32.mrf.mxu0 }
 0x193   : > { %v1194_v34 = vadd.f32 %v2793_v42, %v1193_v33  ;;  %v2834_v42 = vld [vmem:[%s2965_s6] ss:$0 sm:$0xff] }
 0x195   : > { %v1211_v36 = vmax.f32 %v1194_v34, 0.0 }
 0x197   : > { %v1219_v38 = vpack.c.bf16 %v1211_v36, %v1210_v35  ;;  %v1511_v36 = vld [vmem:[%s2968_s9] sm:$0xff] }
 0x198   : > { %1581 = vmatpush.msrb.mxu3 %v1511_v36 }
 0x199   : > { %2318 = vmatmul.msk.bf16.gmra.mxu1 %vm561_vm0, %v1219_v38  ;;  %v933_v38 = vpop.f32.mrf.mxu2 }
 0x1a6   : > { %v1286_v44 = vpop.f32.mrf.mxu1 }
 0x1a7   : > { %v1326_v47 = vadd.f32 %v1286_v44, %v1006_v45 }
 0x1a9   : > { %v1346_v51 = vadd.f32 %v2834_v42, %v1326_v47  ;;  %v935_v47 = vpop.f32.mrf.mxu2 }
 0x1ab   : > { %v1362_v54 = vmax.f32 %v1346_v51, 0.0 }
 0x1ae   : > { %v1288_v50 = vpop.f32.mrf.mxu1 }
 0x1af   : > { %v1327_v52 = vadd.f32 %v1288_v50, %v1008_v49  ;;  %v1032_v49 = vpop.f32.mrf.mxu3 }
 0x1b0   : > { %v1033_v58 = vadd.f32 %v1032_v49, %v935_v47 }
 0x1b1   : > { %v1347_v53 = vadd.f32 %v2834_v42, %v1327_v52 }
 0x1b3   : > { %v1363_v55 = vmax.f32 %v1347_v53, 0.0 }
 0x1b5   : > { %v1378_v57 = vpack.c.bf16 %v1363_v55, %v1362_v54  ;;  %v1031_v54 = vadd.f32 %v1030_v41, %v933_v38  ;;  %v938_v55 = vpop.f32.mrf.mxu2 }
 0x1b6   : > { %v1291_v59 = vpop.f32.mrf.mxu1 }
 0x1b7   : > { %2335 = vmatmul.msk.bf16.vlgmr.msrb.gmra.mxu2 %vm561_vm0, %v1378_v57  ;;  %v1328_v61 = vadd.f32 %v1291_v59, %v1011_v60  ;;  %v1035_v57 = vpop.f32.mrf.mxu3 }
 0x1b9   : > { %v1348_v1 = vadd.f32 %v2834_v42, %v1328_v61 }
 0x1bb   : > { %v1364_v5 = vmax.f32 %v1348_v1, 0.0 }
 0x1bd   : > { %v940_v1 = vpop.f32.mrf.mxu2 }
 0x1be   : > { %v1293_v63 = vpop.f32.mrf.mxu1 }
 0x1bf   : > { %v1329_v2 = vadd.f32 %v1293_v63, %v1013_v62  ;;  %v1037_v3 = vpop.f32.mrf.mxu3 }
 0x1c1   : > { %v1349_v4 = vadd.f32 %v2834_v42, %v1329_v2 }
 0x1c3   : > { %v1365_v6 = vmax.f32 %v1349_v4, 0.0 }
 0x1c5   : > { %v1379_v7 = vpack.c.bf16 %v1365_v6, %v1364_v5  ;;  %v1036_v5 = vadd.f32 %v1035_v57, %v938_v55  ;;  %v943_v11 = vpop.f32.mrf.mxu2 }
 0x1c6   : > { %v1296_v8 = vpop.f32.mrf.mxu1 }
 0x1c7   : > { %2336 = vmatmul.msk.bf16.gmra.mxu2 %vm561_vm0, %v1379_v7  ;;  %v1330_v12 = vadd.f32 %v1296_v8, %v1016_v9  ;;  %v1038_v7 = vadd.f32 %v1037_v3, %v940_v1 }
 0x1c9   : > { %v1350_v15 = vadd.f32 %v2834_v42, %v1330_v12  ;;  %v1040_v12 = vpop.f32.mrf.mxu3 }
 0x1ca   : > { %v1041_v18 = vadd.f32 %v1040_v12, %v943_v11 }
 0x1cb   : > { %v1366_v19 = vmax.f32 %v1350_v15, 0.0 }
 0x1ce   : > { %v1298_v14 = vpop.f32.mrf.mxu1 }
 0x1cf   : > { %v1331_v16 = vadd.f32 %v1298_v14, %v1018_v13 }
 0x1d1   : > { %v1351_v17 = vadd.f32 %v2834_v42, %v1331_v16 }
 0x1d3   : > { %v1367_v20 = vmax.f32 %v1351_v17, 0.0 }
 0x1d5   : > { %v1380_v22 = vpack.c.bf16 %v1367_v20, %v1366_v19  ;;  %v945_v19 = vpop.f32.mrf.mxu2  ;;  %v1042_v20 = vpop.f32.mrf.mxu3 }
 0x1d6   : > { %v1301_v23 = vpop.f32.mrf.mxu1 }
 0x1d7   : > { %2337 = vmatmul.msk.bf16.gmra.mxu2 %vm561_vm0, %v1380_v22  ;;  %v1332_v25 = vadd.f32 %v1301_v23, %v1021_v24  ;;  %v1043_v22 = vadd.f32 %v1042_v20, %v945_v19 }
 0x1d9   : > { %v1352_v30 = vadd.f32 %v2834_v42, %v1332_v25 }
 0x1db   : > { %v1368_v33 = vmax.f32 %v1352_v30, 0.0  ;;  %v2866_v30 = vld [vmem:[%s2967_s8] ss:$0 sm:$0xff] }
 0x1de   : > { %v1303_v29 = vpop.f32.mrf.mxu1 }
 0x1df   : > { %v1333_v31 = vadd.f32 %v1303_v29, %v1023_v26 }
 0x1e1   : > { %v1353_v32 = vadd.f32 %v2834_v42, %v1333_v31 }
 0x1e3   : > { %v1369_v34 = vmax.f32 %v1353_v32, 0.0 }
 0x1e5   : > { %v1381_v35 = vpack.c.bf16 %v1369_v34, %v1368_v33 }
 0x1e6   : > { %v1306_v37 = vpop.f32.mrf.mxu1 }
 0x1e7   : > { %2338 = vmatmul.msk.bf16.gmra.mxu2 %vm561_vm0, %v1381_v35  ;;  %v1334_v40 = vadd.f32 %v1306_v37, %v1026_v39 }
 0x1e9   : > { %v1354_v45 = vadd.f32 %v2834_v42, %v1334_v40 }
 0x1eb   : > { %v1370_v50 = vmax.f32 %v1354_v45, 0.0 }
 0x1ee   : > { %v1308_v44 = vpop.f32.mrf.mxu1 }
 0x1ef   : > { %v1335_v46 = vadd.f32 %v1308_v44, %v1028_v43 }
 0x1f1   : > { %v1355_v48 = vadd.f32 %v2834_v42, %v1335_v46 }
 0x1f3   : > { %v1371_v51 = vmax.f32 %v1355_v48, 0.0 }
 0x1f5   : > { %v1382_v52 = vpack.c.bf16 %v1371_v51, %v1370_v50 }
 0x1f6   : > { %v1311_v53 = vpop.f32.mrf.mxu1 }
 0x1f7   : > { %2339 = vmatmul.msk.bf16.gmra.mxu2 %vm561_vm0, %v1382_v52  ;;  %v1336_v56 = vadd.f32 %v1311_v53, %v1031_v54 }
 0x1f9   : > { %v1356_v60 = vadd.f32 %v2834_v42, %v1336_v56 }
 0x1fb   : > { %v1372_v63 = vmax.f32 %v1356_v60, 0.0 }
 0x1fe   : > { %v1313_v59 = vpop.f32.mrf.mxu1 }
 0x1ff   : > { %v1337_v61 = vadd.f32 %v1313_v59, %v1033_v58 }
 0x201   : > { %v1357_v62 = vadd.f32 %v2834_v42, %v1337_v61 }
 0x203   : > { %v1373_v0 = vmax.f32 %v1357_v62, 0.0 }
 0x205   : > { %v1383_v2 = vpack.c.bf16 %v1373_v0, %v1372_v63 }
 0x206   : > { %v1316_v4 = vpop.f32.mrf.mxu1 }
 0x207   : > { %2340 = vmatmul.msk.bf16.gmra.mxu2 %vm561_vm0, %v1383_v2  ;;  %v1338_v6 = vadd.f32 %v1316_v4, %v1036_v5 }
 0x209   : > { %v1358_v9 = vadd.f32 %v2834_v42, %v1338_v6 }
 0x20b   : > { %v1374_v14 = vmax.f32 %v1358_v9, 0.0 }
 0x20e   : > { %v1318_v8 = vpop.f32.mrf.mxu1 }
 0x20f   : > { %v1339_v10 = vadd.f32 %v1318_v8, %v1038_v7 }
 0x211   : > { %v1359_v13 = vadd.f32 %v2834_v42, %v1339_v10 }
 0x213   : > { %v1375_v15 = vmax.f32 %v1359_v13, 0.0 }
 0x215   : > { %v1384_v16 = vpack.c.bf16 %v1375_v15, %v1374_v14  ;;  %v2900_v15 = vld [vmem:[#allocation2] ss:$0 sm:$0xff] }
 0x216   : > { %v1321_v17 = vpop.f32.mrf.mxu1 }
 0x217   : > { %2341 = vmatmul.msk.bf16.gmra.mxu2 %vm561_vm0, %v1384_v16  ;;  %v1340_v21 = vadd.f32 %v1321_v17, %v1041_v18 }
 0x219   : > { %v1360_v24 = vadd.f32 %v2834_v42, %v1340_v21 }
 0x21b   : > { %v1376_v27 = vmax.f32 %v1360_v24, 0.0 }
 0x21e   : > { %v1323_v23 = vpop.f32.mrf.mxu1 }
 0x21f   : > { %v1341_v25 = vadd.f32 %v1323_v23, %v1043_v22 }
 0x221   : > { %v1361_v26 = vadd.f32 %v2834_v42, %v1341_v25 }
 0x223   : > { %v1377_v28 = vmax.f32 %v1361_v26, 0.0 }
 0x225   : > { %v1385_v29 = vpack.c.bf16 %v1377_v28, %v1376_v27 }
 0x227   : > { %2342 = vmatmul.msk.bf16.gmra.mxu2 %vm561_vm0, %v1385_v29 }
 0x23a   : > { %v1455_v31 = vpop.f32.mrf.mxu2 }
 0x23b   : > { %v1456_v32 = vadd.f32 %v2866_v30, %v1455_v31 }
 0x23d   : > { %v1495_v33 = vmax.f32 %v1456_v32, 0.0 }
 0x23f   : > { %2343 = vmatmul.msk.f32.vlgmr.msrb.gmra.mxu3 %vm1517_vm1, %v1495_v33 }
 0x242   : > { %v1457_v34 = vpop.f32.mrf.mxu2 }
 0x243   : > { %v1458_v42 = vadd.f32 %v2866_v30, %v1457_v34 }
 0x245   : > { %v1496_v35 = vmax.f32 %v1458_v42, 0.0 }
 0x247   : > { %2344 = vmatmul.msk.f32.gmra.mxu3 %vm1517_vm1, %v1496_v35 }
 0x24a   : > { %v1460_v36 = vpop.f32.mrf.mxu2 }
 0x24b   : > { %v1461_v37 = vadd.f32 %v2866_v30, %v1460_v36 }
 0x24d   : > { %v1497_v38 = vmax.f32 %v1461_v37, 0.0 }
 0x24f   : > { %2345 = vmatmul.msk.f32.gmra.mxu3 %vm1517_vm1, %v1497_v38 }
 0x252   : > { %v1462_v41 = vpop.f32.mrf.mxu2 }
 0x253   : > { %v1463_v39 = vadd.f32 %v2866_v30, %v1462_v41 }
 0x255   : > { %v1498_v40 = vmax.f32 %v1463_v39, 0.0 }
 0x257   : > { %2346 = vmatmul.msk.f32.gmra.mxu3 %vm1517_vm1, %v1498_v40 }
 0x25a   : > { %v1465_v43 = vpop.f32.mrf.mxu2 }
 0x25b   : > { %v1466_v44 = vadd.f32 %v2866_v30, %v1465_v43 }
 0x25d   : > { %v1499_v45 = vmax.f32 %v1466_v44, 0.0 }
 0x25f   : > { %2347 = vmatmul.msk.f32.gmra.mxu3 %vm1517_vm1, %v1499_v45 }
 0x262   : > { %v1467_v46 = vpop.f32.mrf.mxu2 }
 0x263   : > { %v1468_v47 = vadd.f32 %v2866_v30, %v1467_v46 }
 0x265   : > { %v1500_v48 = vmax.f32 %v1468_v47, 0.0 }
 0x267   : > { %2348 = vmatmul.msk.f32.gmra.mxu3 %vm1517_vm1, %v1500_v48 }
 0x26a   : > { %v1470_v49 = vpop.f32.mrf.mxu2 }
 0x26b   : > { %v1471_v50 = vadd.f32 %v2866_v30, %v1470_v49 }
 0x26d   : > { %v1501_v51 = vmax.f32 %v1471_v50, 0.0 }
 0x26f   : > { %2349 = vmatmul.msk.f32.gmra.mxu3 %vm1517_vm1, %v1501_v51 }
 0x272   : > { %v1472_v52 = vpop.f32.mrf.mxu2 }
 0x273   : > { %v1473_v53 = vadd.f32 %v2866_v30, %v1472_v52 }
 0x275   : > { %v1502_v54 = vmax.f32 %v1473_v53, 0.0 }
 0x277   : > { %2350 = vmatmul.msk.f32.gmra.mxu3 %vm1517_vm1, %v1502_v54 }
 0x27a   : > { %v1475_v55 = vpop.f32.mrf.mxu2 }
 0x27b   : > { %v1476_v56 = vadd.f32 %v2866_v30, %v1475_v55 }
 0x27d   : > { %v1503_v57 = vmax.f32 %v1476_v56, 0.0 }
 0x27f   : > { %2351 = vmatmul.msk.f32.gmra.mxu3 %vm1517_vm1, %v1503_v57 }
 0x282   : > { %v1477_v58 = vpop.f32.mrf.mxu2 }
 0x283   : > { %v1478_v59 = vadd.f32 %v2866_v30, %v1477_v58 }
 0x285   : > { %v1504_v60 = vmax.f32 %v1478_v59, 0.0 }
 0x287   : > { %2352 = vmatmul.msk.f32.gmra.mxu3 %vm1517_vm1, %v1504_v60 }
 0x28a   : > { %v1480_v61 = vpop.f32.mrf.mxu2 }
 0x28b   : > { %v1481_v62 = vadd.f32 %v2866_v30, %v1480_v61 }
 0x28d   : > { %v1505_v63 = vmax.f32 %v1481_v62, 0.0 }
 0x28f   : > { %2353 = vmatmul.msk.f32.gmra.mxu3 %vm1517_vm1, %v1505_v63 }
 0x292   : > { %v1482_v0 = vpop.f32.mrf.mxu2 }
 0x293   : > { %v1483_v1 = vadd.f32 %v2866_v30, %v1482_v0 }
 0x295   : > { %v1506_v2 = vmax.f32 %v1483_v1, 0.0 }
 0x297   : > { %2354 = vmatmul.msk.f32.gmra.mxu3 %vm1517_vm1, %v1506_v2 }
 0x29a   : > { %v1485_v3 = vpop.f32.mrf.mxu2 }
 0x29b   : > { %v1486_v4 = vadd.f32 %v2866_v30, %v1485_v3 }
 0x29d   : > { %v1507_v5 = vmax.f32 %v1486_v4, 0.0 }
 0x29f   : > { %2355 = vmatmul.msk.f32.gmra.mxu3 %vm1517_vm1, %v1507_v5 }
 0x2a2   : > { %v1487_v6 = vpop.f32.mrf.mxu2 }
 0x2a3   : > { %v1488_v7 = vadd.f32 %v2866_v30, %v1487_v6 }
 0x2a5   : > { %v1508_v8 = vmax.f32 %v1488_v7, 0.0 }
 0x2a7   : > { %2356 = vmatmul.msk.f32.gmra.mxu3 %vm1517_vm1, %v1508_v8 }
 0x2aa   : > { %v1490_v9 = vpop.f32.mrf.mxu2 }
 0x2ab   : > { %v1491_v10 = vadd.f32 %v2866_v30, %v1490_v9 }
 0x2ad   : > { %v1509_v11 = vmax.f32 %v1491_v10, 0.0 }
 0x2af   : > { %2357 = vmatmul.msk.f32.gmra.mxu3 %vm1517_vm1, %v1509_v11 }
 0x2b2   : > { %v1492_v12 = vpop.f32.mrf.mxu2 }
 0x2b3   : > { %v1493_v13 = vadd.f32 %v2866_v30, %v1492_v12 }
 0x2b5   : > { %v1510_v14 = vmax.f32 %v1493_v13, 0.0 }
 0x2b7   : > { %2358 = vmatmul.msk.f32.gmra.mxu3 %vm1517_vm1, %v1510_v14 }
 0x2c2   : > { %v1583_v16 = vpop.f32.mrf.mxu3 }
 0x2c3   : > { %v1584_v17 = vadd.f32 %v2900_v15, %v1583_v16 }
 0x2c5   : > { %v2359_v18 = vmul.f32 -1.442695, %v1584_v17 }
 0x2c7   : > { %2443 = vpow2.f32 %v2359_v18 }
 0x2ca   : > { %v1586_v19 = vpop.f32.mrf.mxu3 }
 0x2cb   : > { %v1587_v20 = vadd.f32 %v2900_v15, %v1586_v19 }
 0x2cd   : > { %v2444_v21 = vpop.eup %2443  ;;  %v2360_v22 = vmul.f32 -1.442695, %v1587_v20 }
 0x2ce   : > { %v1679_v23 = vadd.f32 1.0, %v2444_v21 }
 0x2cf   : > { %2445 = vpow2.f32 %v2360_v22 }
 0x2d0   : > { %2447 = vrcp.f32 %v1679_v23  ;;  %v1706_v32 = vand.u32 2147483648, %v1679_v23  ;;  %v1704_v42 = vand.u32 2147483647, %v1679_v23  ;;  %vm1700_vm3 = vweird.f32 %v1679_v23 }
 0x2d2   : > { %v1589_v24 = vpop.f32.mrf.mxu3  ;;  %v1707_v39 = vor.u32 1.1754944e-38, %v1706_v32  ;;  %vm1705_vm6 = vcmp.eq.f32.partialorder %v1704_v42, 8.507059e+37 }
 0x2d3   : > { %v1590_v25 = vadd.f32 %v2900_v15, %v1589_v24 }
 0x2d5   : > { %v2446_v26 = vpop.eup %2445  ;;  %v2361_v27 = vmul.f32 -1.442695, %v1590_v25 }
 0x2d6   : > { %v2448_v28 = vpop.eup %2447  ;;  %v1680_v29 = vadd.f32 1.0, %v2446_v26 }
 0x2d7   : > { %v1696_v30 = vmul.f32 %v2448_v28, %v1679_v23  ;;  %2449 = vpow2.f32 %v2361_v27  ;;  %vm1701_vm2 = vweird.f32 %v2448_v28 }
 0x2d8   : > { %2451 = vrcp.f32 %v1680_v29  ;;  %vm1702_vm4 = vmor %vm1700_vm3, %vm1701_vm2  ;;  %v1721_v47 = vand.u32 2147483648, %v1680_v29  ;;  %v1719_v50 = vand.u32 2147483647, %v1680_v29  ;;  %vm1715_vm8 = vweird.f32 %v1680_v29 }
 0x2d9   : > { %v1697_v31 = vsub.f32 1.0, %v1696_v30 }
 0x2da   : > { %v1592_v33 = vpop.f32.mrf.mxu3  ;;  %v1722_v56 = vor.u32 1.1754944e-38, %v1721_v47  ;;  %vm1720_vm10 = vcmp.eq.f32.partialorder %v1719_v50, 8.507059e+37 }
 0x2db   : > { %v1698_v34 = vmul.f32 %v2448_v28, %v1697_v31  ;;  %v1593_v35 = vadd.f32 %v2900_v15, %v1592_v33 }
 0x2dd   : > { %v2450_v36 = vpop.eup %2449  ;;  %v1699_v37 = vadd.f32 %v2448_v28, %v1698_v34  ;;  %v2362_v38 = vmul.f32 -1.442695, %v1593_v35 }
 0x2de   : > { %v2452_v41 = vpop.eup %2451  ;;  %v1681_v40 = vadd.f32 1.0, %v2450_v36 }
 0x2df   : > { %v1703_v43 = vsel %vm1702_vm4, %v2448_v28, %v1699_v37  ;;  %v1711_v44 = vmul.f32 %v2452_v41, %v1680_v29  ;;  %2453 = vpow2.f32 %v2362_v38  ;;  %vm1716_vm7 = vweird.f32 %v2452_v41 }
 0x2e0   : > { %v1708_v45 = vsel %vm1705_vm6, %v1707_v39, %v1703_v43  ;;  %2455 = vrcp.f32 %v1681_v40  ;;  %vm1717_vm9 = vmor %vm1715_vm8, %vm1716_vm7  ;;  %v1736_v62 = vand.u32 2147483648, %v1681_v40  ;;  %v1734_v1 = vand.u32 2147483647, %v1681_v40 }
 0x2e1   : > { %1936 = vst.msk [vmem:[%s2910_s17] sm:$0xff] %vm1935_vm5, %v1708_v45  ;;  %v1712_v46 = vsub.f32 1.0, %v1711_v44  ;;  %vm1730_vm12 = vweird.f32 %v1681_v40 }
 0x2e2   : > { %v1595_v48 = vpop.f32.mrf.mxu3  ;;  %v1737_v7 = vor.u32 1.1754944e-38, %v1736_v62  ;;  %vm1735_vm14 = vcmp.eq.f32.partialorder %v1734_v1, 8.507059e+37 }
 0x2e3   : > { %v1713_v49 = vmul.f32 %v2452_v41, %v1712_v46  ;;  %v1596_v51 = vadd.f32 %v2900_v15, %v1595_v48 }
 0x2e5   : > { %v2454_v52 = vpop.eup %2453  ;;  %v1714_v53 = vadd.f32 %v2452_v41, %v1713_v49  ;;  %v2363_v54 = vmul.f32 -1.442695, %v1596_v51 }
 0x2e6   : > { %v2456_v55 = vpop.eup %2455  ;;  %v1682_v57 = vadd.f32 1.0, %v2454_v52 }
 0x2e7   : > { %v1718_v58 = vsel %vm1717_vm9, %v2452_v41, %v1714_v53  ;;  %v1726_v59 = vmul.f32 %v2456_v55, %v1681_v40  ;;  %2457 = vpow2.f32 %v2363_v54  ;;  %vm1731_vm11 = vweird.f32 %v2456_v55 }
 0x2e8   : > { %v1723_v60 = vsel %vm1720_vm10, %v1722_v56, %v1718_v58  ;;  %2459 = vrcp.f32 %v1682_v57  ;;  %vm1732_vm13 = vmor %vm1730_vm12, %vm1731_vm11  ;;  %v1751_v13 = vand.u32 2147483648, %v1682_v57  ;;  %v1749_v17 = vand.u32 2147483647, %v1682_v57 }
 0x2e9   : > { %1937 = vst.msk [vmem:[%s2910_s17 + $0x8] sm:$0xff] %vm1935_vm5, %v1723_v60  ;;  %v1727_v61 = vsub.f32 1.0, %v1726_v59  ;;  %vm1745_vm0 = vweird.f32 %v1682_v57 }
 0x2ea   : > { %v1598_v63 = vpop.f32.mrf.mxu3  ;;  %v1752_v23 = vor.u32 1.1754944e-38, %v1751_v13  ;;  %vm1750_vm2 = vcmp.eq.f32.partialorder %v1749_v17, 8.507059e+37 }
 0x2eb   : > { %v1728_v0 = vmul.f32 %v2456_v55, %v1727_v61  ;;  %v1599_v2 = vadd.f32 %v2900_v15, %v1598_v63 }
 0x2ed   : > { %v2458_v3 = vpop.eup %2457  ;;  %v1729_v4 = vadd.f32 %v2456_v55, %v1728_v0  ;;  %v2364_v5 = vmul.f32 -1.442695, %v1599_v2 }
 0x2ee   : > { %v2460_v6 = vpop.eup %2459  ;;  %v1683_v8 = vadd.f32 1.0, %v2458_v3 }
 0x2ef   : > { %v1733_v9 = vsel %vm1732_vm13, %v2456_v55, %v1729_v4  ;;  %v1741_v10 = vmul.f32 %v2460_v6, %v1682_v57  ;;  %2461 = vpow2.f32 %v2364_v5  ;;  %vm1746_vm15 = vweird.f32 %v2460_v6 }
 0x2f0   : > { %v1738_v11 = vsel %vm1735_vm14, %v1737_v7, %v1733_v9  ;;  %2463 = vrcp.f32 %v1683_v8  ;;  %vm1747_vm1 = vmor %vm1745_vm0, %vm1746_vm15  ;;  %v1766_v29 = vand.u32 2147483648, %v1683_v8  ;;  %v1764_v32 = vand.u32 2147483647, %v1683_v8 }
 0x2f1   : > { %1938 = vst.msk [vmem:[%s2910_s17 + $0x10] sm:$0xff] %vm1935_vm5, %v1738_v11  ;;  %v1742_v12 = vsub.f32 1.0, %v1741_v10  ;;  %vm1760_vm4 = vweird.f32 %v1683_v8 }
 0x2f2   : > { %v1601_v14 = vpop.f32.mrf.mxu3  ;;  %v1767_v37 = vor.u32 1.1754944e-38, %v1766_v29  ;;  %vm1765_vm7 = vcmp.eq.f32.partialorder %v1764_v32, 8.507059e+37 }
 0x2f3   : > { %v1743_v16 = vmul.f32 %v2460_v6, %v1742_v12  ;;  %v1602_v18 = vadd.f32 %v2900_v15, %v1601_v14 }
 0x2f5   : > { %v2462_v19 = vpop.eup %2461  ;;  %v1744_v20 = vadd.f32 %v2460_v6, %v1743_v16  ;;  %v2365_v21 = vmul.f32 -1.442695, %v1602_v18 }
 0x2f6   : > { %v2464_v22 = vpop.eup %2463  ;;  %v1684_v24 = vadd.f32 1.0, %v2462_v19 }
 0x2f7   : > { %v1748_v25 = vsel %vm1747_vm1, %v2460_v6, %v1744_v20  ;;  %v1756_v26 = vmul.f32 %v2464_v22, %v1683_v8  ;;  %2465 = vpow2.f32 %v2365_v21  ;;  %vm1761_vm3 = vweird.f32 %v2464_v22 }
 0x2f8   : > { %v1753_v27 = vsel %vm1750_vm2, %v1752_v23, %v1748_v25  ;;  %2467 = vrcp.f32 %v1684_v24  ;;  %vm1762_vm6 = vmor %vm1760_vm4, %vm1761_vm3  ;;  %v1781_v44 = vand.u32 2147483648, %v1684_v24  ;;  %v1779_v47 = vand.u32 2147483647, %v1684_v24 }
 0x2f9   : > { %1939 = vst.msk [vmem:[%s2910_s17 + $0x18] sm:$0xff] %vm1935_vm5, %v1753_v27  ;;  %v1757_v28 = vsub.f32 1.0, %v1756_v26  ;;  %vm1775_vm9 = vweird.f32 %v1684_v24 }
 0x2fa   : > { %v1604_v30 = vpop.f32.mrf.mxu3  ;;  %v1782_v53 = vor.u32 1.1754944e-38, %v1781_v44  ;;  %vm1780_vm11 = vcmp.eq.f32.partialorder %v1779_v47, 8.507059e+37 }
 0x2fb   : > { %v1758_v31 = vmul.f32 %v2464_v22, %v1757_v28  ;;  %v1605_v33 = vadd.f32 %v2900_v15, %v1604_v30 }
 0x2fd   : > { %v2466_v34 = vpop.eup %2465  ;;  %v1759_v42 = vadd.f32 %v2464_v22, %v1758_v31  ;;  %v2366_v35 = vmul.f32 -1.442695, %v1605_v33 }
 0x2fe   : > { %v2468_v36 = vpop.eup %2467  ;;  %v1685_v38 = vadd.f32 1.0, %v2466_v34 }
 0x2ff   : > { %v1763_v41 = vsel %vm1762_vm6, %v2464_v22, %v1759_v42  ;;  %v1771_v39 = vmul.f32 %v2468_v36, %v1684_v24  ;;  %2469 = vpow2.f32 %v2366_v35  ;;  %vm1776_vm8 = vweird.f32 %v2468_v36 }
 0x300   : > { %v1768_v40 = vsel %vm1765_vm7, %v1767_v37, %v1763_v41  ;;  %2471 = vrcp.f32 %v1685_v38  ;;  %vm1777_vm10 = vmor %vm1775_vm9, %vm1776_vm8  ;;  %v1796_v59 = vand.u32 2147483648, %v1685_v38  ;;  %v1794_v62 = vand.u32 2147483647, %v1685_v38 }
 0x301   : > { %1940 = vst.msk [vmem:[%s2910_s17 + $0x20] sm:$0xff] %vm1935_vm5, %v1768_v40  ;;  %v1772_v43 = vsub.f32 1.0, %v1771_v39  ;;  %vm1790_vm13 = vweird.f32 %v1685_v38 }
 0x302   : > { %v1607_v45 = vpop.f32.mrf.mxu3  ;;  %v1797_v4 = vor.u32 1.1754944e-38, %v1796_v59  ;;  %vm1795_vm15 = vcmp.eq.f32.partialorder %v1794_v62, 8.507059e+37 }
 0x303   : > { %v1773_v46 = vmul.f32 %v2468_v36, %v1772_v43  ;;  %v1608_v48 = vadd.f32 %v2900_v15, %v1607_v45 }
 0x305   : > { %v2470_v49 = vpop.eup %2469  ;;  %v1774_v50 = vadd.f32 %v2468_v36, %v1773_v46  ;;  %v2367_v51 = vmul.f32 -1.442695, %v1608_v48 }
 0x306   : > { %v2472_v52 = vpop.eup %2471  ;;  %v1686_v54 = vadd.f32 1.0, %v2470_v49 }
 0x307   : > { %v1778_v55 = vsel %vm1777_vm10, %v2468_v36, %v1774_v50  ;;  %v1786_v56 = vmul.f32 %v2472_v52, %v1685_v38  ;;  %2473 = vpow2.f32 %v2367_v51  ;;  %vm1791_vm12 = vweird.f32 %v2472_v52 }
 0x308   : > { %v1783_v57 = vsel %vm1780_vm11, %v1782_v53, %v1778_v55  ;;  %2475 = vrcp.f32 %v1686_v54  ;;  %vm1792_vm14 = vmor %vm1790_vm13, %vm1791_vm12  ;;  %v1811_v10 = vand.u32 2147483648, %v1686_v54  ;;  %v1809_v13 = vand.u32 2147483647, %v1686_v54 }
 0x309   : > { %1941 = vst.msk [vmem:[%s2910_s17 + $0x28] sm:$0xff] %vm1935_vm5, %v1783_v57  ;;  %v1787_v58 = vsub.f32 1.0, %v1786_v56  ;;  %vm1805_vm1 = vweird.f32 %v1686_v54 }
 0x30a   : > { %v1610_v60 = vpop.f32.mrf.mxu3  ;;  %v1812_v20 = vor.u32 1.1754944e-38, %v1811_v10  ;;  %vm1810_vm3 = vcmp.eq.f32.partialorder %v1809_v13, 8.507059e+37 }
 0x30b   : > { %v1788_v61 = vmul.f32 %v2472_v52, %v1787_v58  ;;  %v1611_v63 = vadd.f32 %v2900_v15, %v1610_v60 }
 0x30d   : > { %v2474_v0 = vpop.eup %2473  ;;  %v1789_v1 = vadd.f32 %v2472_v52, %v1788_v61  ;;  %v2368_v2 = vmul.f32 -1.442695, %v1611_v63 }
 0x30e   : > { %v2476_v3 = vpop.eup %2475  ;;  %v1687_v5 = vadd.f32 1.0, %v2474_v0 }
 0x30f   : > { %v1793_v6 = vsel %vm1792_vm14, %v2472_v52, %v1789_v1  ;;  %v1801_v7 = vmul.f32 %v2476_v3, %v1686_v54  ;;  %2477 = vpow2.f32 %v2368_v2  ;;  %vm1806_vm0 = vweird.f32 %v2476_v3 }
 0x310   : > { %v1798_v8 = vsel %vm1795_vm15, %v1797_v4, %v1793_v6  ;;  %2479 = vrcp.f32 %v1687_v5  ;;  %vm1807_vm2 = vmor %vm1805_vm1, %vm1806_vm0  ;;  %v1826_v26 = vand.u32 2147483648, %v1687_v5  ;;  %v1824_v29 = vand.u32 2147483647, %v1687_v5 }
 0x311   : > { %1942 = vst.msk [vmem:[%s2910_s17 + $0x30] sm:$0xff] %vm1935_vm5, %v1798_v8  ;;  %v1802_v9 = vsub.f32 1.0, %v1801_v7  ;;  %vm1820_vm6 = vweird.f32 %v1687_v5 }
 0x312   : > { %v1613_v11 = vpop.f32.mrf.mxu3  ;;  %v1827_v42 = vor.u32 1.1754944e-38, %v1826_v26  ;;  %vm1825_vm8 = vcmp.eq.f32.partialorder %v1824_v29, 8.507059e+37 }
 0x313   : > { %v1803_v12 = vmul.f32 %v2476_v3, %v1802_v9  ;;  %v1614_v14 = vadd.f32 %v2900_v15, %v1613_v11 }
 0x315   : > { %v2478_v16 = vpop.eup %2477  ;;  %v1804_v17 = vadd.f32 %v2476_v3, %v1803_v12  ;;  %v2369_v18 = vmul.f32 -1.442695, %v1614_v14 }
 0x316   : > { %v2480_v19 = vpop.eup %2479  ;;  %v1688_v21 = vadd.f32 1.0, %v2478_v16 }
 0x317   : > { %v1808_v22 = vsel %vm1807_vm2, %v2476_v3, %v1804_v17  ;;  %v1816_v23 = vmul.f32 %v2480_v19, %v1687_v5  ;;  %2481 = vpow2.f32 %v2369_v18  ;;  %vm1821_vm4 = vweird.f32 %v2480_v19 }
 0x318   : > { %v1813_v24 = vsel %vm1810_vm3, %v1812_v20, %v1808_v22  ;;  %2483 = vrcp.f32 %v1688_v21  ;;  %vm1822_vm7 = vmor %vm1820_vm6, %vm1821_vm4  ;;  %v1841_v39 = vand.u32 2147483648, %v1688_v21  ;;  %v1839_v44 = vand.u32 2147483647, %v1688_v21 }
 0x319   : > { %1943 = vst.msk [vmem:[%s2910_s17 + $0x38] sm:$0xff] %vm1935_vm5, %v1813_v24  ;;  %v1817_v25 = vsub.f32 1.0, %v1816_v23  ;;  %vm1835_vm10 = vweird.f32 %v1688_v21 }
 0x31a   : > { %v1616_v27 = vpop.f32.mrf.mxu3  ;;  %v1842_v50 = vor.u32 1.1754944e-38, %v1841_v39  ;;  %vm1840_vm12 = vcmp.eq.f32.partialorder %v1839_v44, 8.507059e+37 }
 0x31b   : > { %v1818_v28 = vmul.f32 %v2480_v19, %v1817_v25  ;;  %v1617_v30 = vadd.f32 %v2900_v15, %v1616_v27 }
 0x31d   : > { %v2482_v31 = vpop.eup %2481  ;;  %v1819_v32 = vadd.f32 %v2480_v19, %v1818_v28  ;;  %v2370_v33 = vmul.f32 -1.442695, %v1617_v30 }
 0x31e   : > { %v2484_v34 = vpop.eup %2483  ;;  %v1689_v35 = vadd.f32 1.0, %v2482_v31 }
 0x31f   : > { %v1823_v36 = vsel %vm1822_vm7, %v2480_v19, %v1819_v32  ;;  %v1831_v37 = vmul.f32 %v2484_v34, %v1688_v21  ;;  %2485 = vpow2.f32 %v2370_v33  ;;  %vm1836_vm9 = vweird.f32 %v2484_v34 }
 0x320   : > { %v1828_v38 = vsel %vm1825_vm8, %v1827_v42, %v1823_v36  ;;  %2487 = vrcp.f32 %v1689_v35  ;;  %vm1837_vm11 = vmor %vm1835_vm10, %vm1836_vm9  ;;  %v1856_v56 = vand.u32 2147483648, %v1689_v35  ;;  %v1854_v59 = vand.u32 2147483647, %v1689_v35 }
 0x321   : > { %1944 = vst.msk [vmem:[%s2910_s17 + $0x40] sm:$0xff] %vm1935_vm5, %v1828_v38  ;;  %v1832_v41 = vsub.f32 1.0, %v1831_v37  ;;  %vm1850_vm14 = vweird.f32 %v1689_v35 }
 0x322   : > { %v1619_v40 = vpop.f32.mrf.mxu3  ;;  %v1857_v1 = vor.u32 1.1754944e-38, %v1856_v56  ;;  %vm1855_vm0 = vcmp.eq.f32.partialorder %v1854_v59, 8.507059e+37 }
 0x323   : > { %v1833_v43 = vmul.f32 %v2484_v34, %v1832_v41  ;;  %v1620_v45 = vadd.f32 %v2900_v15, %v1619_v40 }
 0x325   : > { %v2486_v46 = vpop.eup %2485  ;;  %v1834_v47 = vadd.f32 %v2484_v34, %v1833_v43  ;;  %v2371_v48 = vmul.f32 -1.442695, %v1620_v45 }
 0x326   : > { %v2488_v49 = vpop.eup %2487  ;;  %v1690_v51 = vadd.f32 1.0, %v2486_v46 }
 0x327   : > { %v1838_v52 = vsel %vm1837_vm11, %v2484_v34, %v1834_v47  ;;  %v1846_v53 = vmul.f32 %v2488_v49, %v1689_v35  ;;  %2489 = vpow2.f32 %v2371_v48  ;;  %vm1851_vm13 = vweird.f32 %v2488_v49 }
 0x328   : > { %v1843_v54 = vsel %vm1840_vm12, %v1842_v50, %v1838_v52  ;;  %2491 = vrcp.f32 %v1690_v51  ;;  %vm1852_vm15 = vmor %vm1850_vm14, %vm1851_vm13  ;;  %v1871_v7 = vand.u32 2147483648, %v1690_v51  ;;  %v1869_v10 = vand.u32 2147483647, %v1690_v51 }
 0x329   : > { %1945 = vst.msk [vmem:[%s2910_s17 + $0x48] sm:$0xff] %vm1935_vm5, %v1843_v54  ;;  %v1847_v55 = vsub.f32 1.0, %v1846_v53  ;;  %vm1865_vm2 = vweird.f32 %v1690_v51 }
 0x32a   : > { %v1622_v57 = vpop.f32.mrf.mxu3  ;;  %v1872_v17 = vor.u32 1.1754944e-38, %v1871_v7  ;;  %vm1870_vm4 = vcmp.eq.f32.partialorder %v1869_v10, 8.507059e+37 }
 0x32b   : > { %v1848_v58 = vmul.f32 %v2488_v49, %v1847_v55  ;;  %v1623_v60 = vadd.f32 %v2900_v15, %v1622_v57 }
 0x32d   : > { %v2490_v61 = vpop.eup %2489  ;;  %v1849_v62 = vadd.f32 %v2488_v49, %v1848_v58  ;;  %v2372_v63 = vmul.f32 -1.442695, %v1623_v60 }
 0x32e   : > { %v2492_v0 = vpop.eup %2491  ;;  %v1691_v2 = vadd.f32 1.0, %v2490_v61 }
 0x32f   : > { %v1853_v3 = vsel %vm1852_vm15, %v2488_v49, %v1849_v62  ;;  %v1861_v4 = vmul.f32 %v2492_v0, %v1690_v51  ;;  %2493 = vpow2.f32 %v2372_v63  ;;  %vm1866_vm1 = vweird.f32 %v2492_v0 }
 0x330   : > { %v1858_v5 = vsel %vm1855_vm0, %v1857_v1, %v1853_v3  ;;  %2495 = vrcp.f32 %v1691_v2  ;;  %vm1867_vm3 = vmor %vm1865_vm2, %vm1866_vm1  ;;  %v1886_v23 = vand.u32 2147483648, %v1691_v2  ;;  %v1884_v26 = vand.u32 2147483647, %v1691_v2 }
 0x331   : > { %1946 = vst.msk [vmem:[%s2910_s17 + $0x50] sm:$0xff] %vm1935_vm5, %v1858_v5  ;;  %v1862_v6 = vsub.f32 1.0, %v1861_v4  ;;  %vm1880_vm7 = vweird.f32 %v1691_v2 }
 0x332   : > { %v1625_v8 = vpop.f32.mrf.mxu3  ;;  %v1887_v32 = vor.u32 1.1754944e-38, %v1886_v23  ;;  %vm1885_vm9 = vcmp.eq.f32.partialorder %v1884_v26, 8.507059e+37 }
 0x333   : > { %v1863_v9 = vmul.f32 %v2492_v0, %v1862_v6  ;;  %v1626_v11 = vadd.f32 %v2900_v15, %v1625_v8 }
 0x335   : > { %v2494_v12 = vpop.eup %2493  ;;  %v1864_v13 = vadd.f32 %v2492_v0, %v1863_v9  ;;  %v2373_v14 = vmul.f32 -1.442695, %v1626_v11 }
 0x336   : > { %v2496_v16 = vpop.eup %2495  ;;  %v1692_v18 = vadd.f32 1.0, %v2494_v12 }
 0x337   : > { %v1868_v19 = vsel %vm1867_vm3, %v2492_v0, %v1864_v13  ;;  %v1876_v20 = vmul.f32 %v2496_v16, %v1691_v2  ;;  %2497 = vpow2.f32 %v2373_v14  ;;  %vm1881_vm6 = vweird.f32 %v2496_v16 }
 0x338   : > { %v1873_v21 = vsel %vm1870_vm4, %v1872_v17, %v1868_v19  ;;  %2499 = vrcp.f32 %v1692_v18  ;;  %vm1882_vm8 = vmor %vm1880_vm7, %vm1881_vm6  ;;  %v1901_v37 = vand.u32 2147483648, %v1692_v18  ;;  %v1899_v38 = vand.u32 2147483647, %v1692_v18 }
 0x339   : > { %1947 = vst.msk [vmem:[%s2910_s17 + $0x58] sm:$0xff] %vm1935_vm5, %v1873_v21  ;;  %v1877_v22 = vsub.f32 1.0, %v1876_v20  ;;  %vm1895_vm11 = vweird.f32 %v1692_v18 }
 0x33a   : > { %v1628_v24 = vpop.f32.mrf.mxu3  ;;  %v1902_v43 = vor.u32 1.1754944e-38, %v1901_v37  ;;  %vm1900_vm13 = vcmp.eq.f32.partialorder %v1899_v38, 8.507059e+37 }
 0x33b   : > { %v1878_v25 = vmul.f32 %v2496_v16, %v1877_v22  ;;  %v1629_v27 = vadd.f32 %v2900_v15, %v1628_v24 }
 0x33d   : > { %v2498_v28 = vpop.eup %2497  ;;  %v1879_v29 = vadd.f32 %v2496_v16, %v1878_v25  ;;  %v2374_v30 = vmul.f32 -1.442695, %v1629_v27 }
 0x33e   : > { %v2500_v31 = vpop.eup %2499  ;;  %v1693_v33 = vadd.f32 1.0, %v2498_v28 }
 0x33f   : > { %v1883_v34 = vsel %vm1882_vm8, %v2496_v16, %v1879_v29  ;;  %v1891_v42 = vmul.f32 %v2500_v31, %v1692_v18  ;;  %2501 = vpow2.f32 %v2374_v30  ;;  %vm1896_vm10 = vweird.f32 %v2500_v31 }
 0x340   : > { %v1888_v35 = vsel %vm1885_vm9, %v1887_v32, %v1883_v34  ;;  %2503 = vrcp.f32 %v1693_v33  ;;  %vm1897_vm12 = vmor %vm1895_vm11, %vm1896_vm10  ;;  %v1916_v49 = vand.u32 2147483648, %v1693_v33  ;;  %v1914_v51 = vand.u32 2147483647, %v1693_v33 }
 0x341   : > { %1948 = vst.msk [vmem:[%s2910_s17 + $0x60] sm:$0xff] %vm1935_vm5, %v1888_v35  ;;  %v1892_v36 = vsub.f32 1.0, %v1891_v42  ;;  %vm1910_vm15 = vweird.f32 %v1693_v33 }
 0x342   : > { %v1917_v54 = vor.u32 1.1754944e-38, %v1916_v49  ;;  %vm1915_vm1 = vcmp.eq.f32.partialorder %v1914_v51, 8.507059e+37 }
 0x343   : > { %v1893_v15 = vmul.f32 %v2500_v31, %v1892_v36 }
 0x345   : > { %v2502_v41 = vpop.eup %2501  ;;  %v1894_v39 = vadd.f32 %v2500_v31, %v1893_v15 }
 0x346   : > { %v2504_v40 = vpop.eup %2503  ;;  %v1694_v44 = vadd.f32 1.0, %v2502_v41 }
 0x347   : > { %v1898_v45 = vsel %vm1897_vm12, %v2500_v31, %v1894_v39  ;;  %v1906_v46 = vmul.f32 %v2504_v40, %v1693_v33  ;;  %vm1911_vm14 = vweird.f32 %v2504_v40 }
 0x348   : > { %v1903_v47 = vsel %vm1900_vm13, %v1902_v43, %v1898_v45  ;;  %2505 = vrcp.f32 %v1694_v44  ;;  %vm1912_vm0 = vmor %vm1910_vm15, %vm1911_vm14  ;;  %v1931_v59 = vand.u32 2147483648, %v1694_v44  ;;  %v1929_v61 = vand.u32 2147483647, %v1694_v44 }
 0x349   : > { %1949 = vst.msk [vmem:[%s2910_s17 + $0x68] sm:$0xff] %vm1935_vm5, %v1903_v47  ;;  %v1907_v48 = vsub.f32 1.0, %v1906_v46  ;;  %vm1925_vm3 = vweird.f32 %v1694_v44 }
 0x34a   : > { %v1932_v63 = vor.u32 1.1754944e-38, %v1931_v59  ;;  %vm1930_vm6 = vcmp.eq.f32.partialorder %v1929_v61, 8.507059e+37 }
 0x34b   : > { %v1908_v50 = vmul.f32 %v2504_v40, %v1907_v48 }
 0x34d   : > { %v1909_v52 = vadd.f32 %v2504_v40, %v1908_v50 }
 0x34e   : > { %v2506_v53 = vpop.eup %2505 }
 0x34f   : > { %v1913_v55 = vsel %vm1912_vm0, %v2504_v40, %v1909_v52  ;;  %v1921_v56 = vmul.f32 %v2506_v53, %v1694_v44  ;;  %vm1926_vm2 = vweird.f32 %v2506_v53 }
 0x350   : > { %v1918_v57 = vsel %vm1915_vm1, %v1917_v54, %v1913_v55  ;;  %vm1927_vm4 = vmor %vm1925_vm3, %vm1926_vm2 }
 0x351   : > { %1950 = vst.msk [vmem:[%s2910_s17 + $0x70] sm:$0xff] %vm1935_vm5, %v1918_v57  ;;  %v1922_v58 = vsub.f32 1.0, %v1921_v56 }
 0x353   : > { %v1923_v60 = vmul.f32 %v2506_v53, %v1922_v58 }
 0x355   : > { %v1924_v62 = vadd.f32 %v2506_v53, %v1923_v60 }
 0x357   : > { %v1928_v0 = vsel %vm1927_vm4, %v2506_v53, %v1924_v62 }
 0x358   : > { %v1933_v1 = vsel %vm1930_vm6, %v1932_v63, %v1928_v0 }
 0x359   : > { %1951 = vst.msk [vmem:[%s2910_s17 + $0x78] sm:$0xff] %vm1935_vm5, %v1933_v1 }
 0x35a PF: > { %s23_s19 = sadd.s32 1, %s2513_s19  }
 0x35b   : > { %p20_p4 = scmp.ge.s32.totalorder %s23_s19, 4  }
 0x35d   :  { %22 = sbr.rel (!%p20_p4) target bundleno = 3 (0x3), region = 106 }

</bundles_post_ra>
